<compile_context>
chip_gen: v5e
topology: v5e:2x2
jax: 0.10.0
libtpu: 0.0.40
codegen_flags: <defaults>
</compile_context>

<pallas_src>
import functools

import jax
import jax.numpy as jnp
from jax.experimental import pallas as pl
from jax.experimental.pallas import tpu as pltpu

EPS = 1e-5  # nn.LayerNorm default eps


def transformer_kernel(x_ref,
                       wq_ref, wk_ref, wv_ref,
                       g1_ref, bt1_ref,
                       wf1_ref, bf1_ref, wf2_ref, bf2_ref,
                       g2_ref, bt2_ref,
                       head_w_ref, head_b_ref,
                       o_ref,
                       h_scr,
                       *, bt_tile, seq_len, scale):
    """One (batch-tile, transformer-block) grid step."""
    blk = pl.program_id(1)
    last_blk = pl.num_programs(1) - 1

    # Initialise the carried activation from the embedded input at block 0.
    @pl.when(blk == 0)
    def _():
        h_scr[...] = x_ref[...]

    M, E = h_scr.shape                     # M = bt_tile * seq_len
    h = h_scr[...]                         # (M, E) float32
    h_bf = h.astype(jnp.bfloat16)

    # ---- SelfAttention (single head: heads_no is unused by the reference) ----
    q = jnp.dot(h_bf, wq_ref[...], preferred_element_type=jnp.float32)
    k = jnp.dot(h_bf, wk_ref[...], preferred_element_type=jnp.float32)
    v = jnp.dot(h_bf, wv_ref[...], preferred_element_type=jnp.float32)
    q3 = q.reshape(bt_tile, seq_len, E).astype(jnp.bfloat16)
    k3 = k.reshape(bt_tile, seq_len, E).astype(jnp.bfloat16)
    v3 = v.reshape(bt_tile, seq_len, E).astype(jnp.bfloat16)

    # Batched scores without an explicit transpose; f32 accumulation.
    scores = jnp.einsum('btd,bsd->bts', q3, k3,
                        preferred_element_type=jnp.float32)          # (bt, T, T)
    m = jnp.max(scores, axis=-1, keepdims=True)
    e = jnp.exp(scores - m)
    # reference divides by sqrt(E) AFTER softmax -> fold into the denominator
    denom = jnp.sum(e, axis=-1, keepdims=True) * scale
    attn = (e * pl.reciprocal(denom, approx=True)).astype(jnp.bfloat16)
    att = jnp.einsum('bts,bsd->btd', attn, v3,
                     preferred_element_type=jnp.float32).reshape(M, E)

    # ---- norm1(attention + x), float32 ----
    r1 = att + h
    mu1 = jnp.mean(r1, axis=-1, keepdims=True)
    var1 = jnp.mean((r1 - mu1) ** 2, axis=-1, keepdims=True)
    h1 = (r1 - mu1) * jax.lax.rsqrt(var1 + EPS) * g1_ref[...] + bt1_ref[...]

    # ---- feed-forward: Linear(E, 4E) -> ReLU -> Linear(4E, E) ----
    ff = jnp.dot(h1.astype(jnp.bfloat16), wf1_ref[...],
                 preferred_element_type=jnp.float32) + bf1_ref[...]
    ff = jnp.maximum(ff, 0.0)
    ff = jnp.dot(ff.astype(jnp.bfloat16), wf2_ref[...],
                 preferred_element_type=jnp.float32) + bf2_ref[...]

    # ---- norm2(ff + norm1-output), float32 ----
    r2 = ff + h1
    mu2 = jnp.mean(r2, axis=-1, keepdims=True)
    var2 = jnp.mean((r2 - mu2) ** 2, axis=-1, keepdims=True)
    h_new = (r2 - mu2) * jax.lax.rsqrt(var2 + EPS) * g2_ref[...] + bt2_ref[...]
    h_scr[...] = h_new

    # ---- classifier head (last block only): max-pool -> linear -> log_softmax ----
    @pl.when(blk == last_blk)
    def _():
        pooled = jnp.max(h_new.reshape(bt_tile, seq_len, E), axis=1)   # (bt, E)
        logits = jnp.dot(pooled.astype(jnp.bfloat16), head_w_ref[...],
                         preferred_element_type=jnp.float32) + head_b_ref[...]
        lm = jnp.max(logits, axis=-1, keepdims=True)
        z = logits - lm
        lse = jnp.log(jnp.sum(jnp.exp(z), axis=-1, keepdims=True))
        o_ref[...] = z - lse     # lane-dense (bt_tile, C_pad) store; padded cols junk


def prepare_params(block_params, head_w, head_b):
    """One-time parameter packing (off the per-call critical path):
      * stack per-block tensors along a leading num_blocks axis (the grid axis),
      * cast matmul weights to bf16 (MXU operands); norms/biases stay float32,
      * pad the classification head to a lane-dense 128-wide slab
        (padded bias = -1e30 so padded classes vanish from the log-softmax).
    """
    stacks = [jnp.stack([blk[i] for blk in block_params]) for i in range(11)]
    wq, wk, wv, g1, bt1, wf1, bf1, wf2, bf2, g2, bt2 = stacks
    bf16 = jnp.bfloat16
    f32 = jnp.float32
    E, C = head_w.shape
    C_pad = max(128, pl.cdiv(C, 128) * 128)
    head_w_pad = jnp.zeros((E, C_pad), f32).at[:, :C].set(head_w)
    head_b_pad = jnp.full((1, C_pad), -1e30, f32).at[:, :C].set(head_b)
    return dict(
        wq=wq.astype(bf16), wk=wk.astype(bf16), wv=wv.astype(bf16),
        g1=g1.astype(f32), bt1=bt1.astype(f32),
        wf1=wf1.astype(bf16), bf1=bf1.astype(f32),
        wf2=wf2.astype(bf16), bf2=bf2.astype(f32),
        g2=g2.astype(f32), bt2=bt2.astype(f32),
        head_w=head_w_pad.astype(bf16), head_b=head_b_pad,
        embedding_size=E, num_classes=C, c_pad=C_pad,
        num_blocks=len(block_params),
    )


def classifier_transformer_forward(token_ids, tok_emb, pos_emb, params, *, bt_tile=8):
    B, T = token_ids.shape
    E = params["embedding_size"]
    C = params["num_classes"]
    C_pad = params["c_pad"]
    NB = params["num_blocks"]

    # Embedding lookups + positional add (glue; gather stays in plain JAX).
    tokens = jnp.take(tok_emb, token_ids, axis=0)                     # (B, T, E)
    positions = pos_emb[:T][None, :, :]                               # (1, T, E)
    h = (tokens + positions).astype(jnp.float32)
    # dropout p=0.0 -> identity

    # Pad batch to a multiple of the batch tile: sublane-dense output stores and a
    # parallel batch grid axis (sharded across TensorCores on v7x megacore).
    B_pad = pl.cdiv(B, bt_tile) * bt_tile
    if B_pad != B:
        h = jnp.pad(h, ((0, B_pad - B), (0, 0), (0, 0)))
    x2d = h.reshape(B_pad * T, E)        # batch folded into M once, in the wrapper

    scale = float(E) ** 0.5
    M_tile = bt_tile * T
    grid = (B_pad // bt_tile, NB)

    def blk_spec(shape):
        # Per-block weight: leading num_blocks dim indexed by the block grid axis
        # and squeezed away inside the kernel.
        return pl.BlockSpec((pl.Squeezed(),) + shape,
                            lambda i, b: (b,) + (0,) * len(shape))

    in_specs = [
        pl.BlockSpec((M_tile, E), lambda i, b: (i, 0)),          # x (resident per batch tile)
        blk_spec((E, E)), blk_spec((E, E)), blk_spec((E, E)),    # wq wk wv
        blk_spec((1, E)), blk_spec((1, E)),                      # gamma1 beta1
        blk_spec((E, 4 * E)), blk_spec((1, 4 * E)),              # wf1 bf1
        blk_spec((4 * E, E)), blk_spec((1, E)),                  # wf2 bf2
        blk_spec((1, E)), blk_spec((1, E)),                      # gamma2 beta2
        pl.BlockSpec((E, C_pad), lambda i, b: (0, 0)),           # head_w (resident)
        pl.BlockSpec((1, C_pad), lambda i, b: (0, 0)),           # head_b (resident)
    ]
    out_spec = pl.BlockSpec((bt_tile, C_pad), lambda i, b: (i, 0))

    kernel = functools.partial(transformer_kernel,
                               bt_tile=bt_tile, seq_len=T, scale=scale)

    out_pad = pl.pallas_call(
        kernel,
        out_shape=jax.ShapeDtypeStruct((B_pad, C_pad), jnp.float32),
        grid=grid,
        in_specs=in_specs,
        out_specs=out_spec,
        scratch_shapes=[pltpu.VMEM((M_tile, E), jnp.float32)],
        compiler_params=pltpu.CompilerParams(
            dimension_semantics=("parallel", "arbitrary"),
            vmem_limit_bytes=32 * 1024 * 1024),
    )(x2d,
      params["wq"], params["wk"], params["wv"],
      params["g1"], params["bt1"],
      params["wf1"], params["bf1"], params["wf2"], params["bf2"],
      params["g2"], params["bt2"],
      params["head_w"], params["head_b"])

    return out_pad[:B, :C]


if __name__ == "__main__":
    # Small, module-consistent shapes
    B, T, E = 2, 8, 32
    heads_no = 8                 # unused by the reference attention math
    vocabulary_size = 50
    max_input_length = 16
    num_classes = 10
    transformer_block_no = 2

    key = jax.random.PRNGKey(0)
    keys = iter(jax.random.split(key, 32))

    def rnd(shape, s=0.05):
        return jax.random.normal(next(keys), shape, jnp.float32) * s

    tok_emb = rnd((vocabulary_size, E), 0.02)
    pos_emb = rnd((max_input_length, E), 0.02)

    block_params = []
    for _ in range(transformer_block_no):
        wq = rnd((E, E))
        wk = rnd((E, E))
        wv = rnd((E, E))
        g1 = jnp.ones((1, E), jnp.float32)
        bt1 = jnp.zeros((1, E), jnp.float32)
        wf1 = rnd((E, 4 * E))
        bf1 = rnd((1, 4 * E))
        wf2 = rnd((4 * E, E))
        bf2 = rnd((1, E))
        g2 = jnp.ones((1, E), jnp.float32)
        bt2 = jnp.zeros((1, E), jnp.float32)
        block_params.append((wq, wk, wv, g1, bt1, wf1, bf1, wf2, bf2, g2, bt2))

    head_w = rnd((E, num_classes))
    head_b = rnd((1, num_classes))

    # One-time parameter packing (stack blocks, bf16 cast, pad head).
    params = prepare_params(block_params, head_w, head_b)

    token_ids = jax.random.randint(next(keys), (B, T), 0, vocabulary_size)

    out = classifier_transformer_forward(token_ids, tok_emb, pos_emb, params)
    jax.block_until_ready(out)
    assert out.shape == (B, num_classes)
    # log-softmax rows must exp-sum to 1 and be finite
    assert bool(jnp.all(jnp.isfinite(out)))
    assert bool(jnp.allclose(jnp.exp(out).sum(axis=-1), 1.0, atol=1e-3))
    print("KERNEL_OK")
</pallas_src>

<mosaic_0001>
module attributes {stable_mosaic.version = 11 : i64} {
  func.func @transformer_kernel(%arg0: i32, %arg1: i32, %arg2: memref<64x32xf32, #tpu.memory_space<vmem>>, %arg3: memref<1x32x32xbf16, #tpu.memory_space<vmem>>, %arg4: memref<1x32x32xbf16, #tpu.memory_space<vmem>>, %arg5: memref<1x32x32xbf16, #tpu.memory_space<vmem>>, %arg6: memref<1x1x32xf32, #tpu.memory_space<vmem>>, %arg7: memref<1x1x32xf32, #tpu.memory_space<vmem>>, %arg8: memref<1x32x128xbf16, #tpu.memory_space<vmem>>, %arg9: memref<1x1x128xf32, #tpu.memory_space<vmem>>, %arg10: memref<1x128x32xbf16, #tpu.memory_space<vmem>>, %arg11: memref<1x1x32xf32, #tpu.memory_space<vmem>>, %arg12: memref<1x1x32xf32, #tpu.memory_space<vmem>>, %arg13: memref<1x1x32xf32, #tpu.memory_space<vmem>>, %arg14: memref<32x128xbf16, #tpu.memory_space<vmem>>, %arg15: memref<1x128xf32, #tpu.memory_space<vmem>>, %arg16: memref<8x128xf32, #tpu.memory_space<vmem>>, %arg17: memref<64x32xf32, #tpu.memory_space<vmem>>) attributes {dimension_semantics = [#tpu.dimension_semantics<parallel>, #tpu.dimension_semantics<arbitrary>], iteration_bounds = array<i64: 1, 2>, scalar_prefetch = 0 : i64, scratch_operands = 1 : i64, tpu.core_type = #tpu.core_type<tc>, window_params = [{transform_indices = @transform_0, window_bounds = array<i64: 64, 32>}, {transform_indices = @transform_1, window_bounds = array<i64: 1, 32, 32>}, {transform_indices = @transform_2, window_bounds = array<i64: 1, 32, 32>}, {transform_indices = @transform_3, window_bounds = array<i64: 1, 32, 32>}, {transform_indices = @transform_4, window_bounds = array<i64: 1, 1, 32>}, {transform_indices = @transform_5, window_bounds = array<i64: 1, 1, 32>}, {transform_indices = @transform_6, window_bounds = array<i64: 1, 32, 128>}, {transform_indices = @transform_7, window_bounds = array<i64: 1, 1, 128>}, {transform_indices = @transform_8, window_bounds = array<i64: 1, 128, 32>}, {transform_indices = @transform_9, window_bounds = array<i64: 1, 1, 32>}, {transform_indices = @transform_10, window_bounds = array<i64: 1, 1, 32>}, {transform_indices = @transform_11, window_bounds = array<i64: 1, 1, 32>}, {pipeline_mode = #tpu.pipeline_mode<synchronous>, transform_indices = @transform_12, window_bounds = array<i64: 32, 128>}, {pipeline_mode = #tpu.pipeline_mode<synchronous>, transform_indices = @transform_13, window_bounds = array<i64: 1, 128>}, {transform_indices = @transform_14, window_bounds = array<i64: 8, 128>}]} {
    %c0_i32 = arith.constant 0 : i32
    %0 = arith.cmpi eq, %arg1, %c0_i32 : i32
    %1 = arith.extui %0 : i1 to i32
    %c0_i32_0 = arith.constant 0 : i32
    %2 = arith.cmpi ne, %1, %c0_i32_0 : i32
    scf.if %2 {
      %c0_58 = arith.constant 0 : index
      %c0_59 = arith.constant 0 : index
      %112 = vector.load %arg2[%c0_58, %c0_59] : memref<64x32xf32, #tpu.memory_space<vmem>>, vector<64x32xf32>
      %c0_60 = arith.constant 0 : index
      %c0_61 = arith.constant 0 : index
      %113 = vector.load %arg17[%c0_60, %c0_61] : memref<64x32xf32, #tpu.memory_space<vmem>>, vector<64x32xf32>
      tpu.vector_store %arg17[%c0_60, %c0_61], %112 {strides = array<i32>} : memref<64x32xf32, #tpu.memory_space<vmem>>, vector<64x32xf32>,
    } else {
    }
    %c0 = arith.constant 0 : index
    %c0_1 = arith.constant 0 : index
    %3 = vector.load %arg17[%c0, %c0_1] : memref<64x32xf32, #tpu.memory_space<vmem>>, vector<64x32xf32>
    %4 = arith.truncf %3 : vector<64x32xf32> to vector<64x32xbf16>
    %c0_2 = arith.constant 0 : index
    %c0_3 = arith.constant 0 : index
    %c0_4 = arith.constant 0 : index
    %5 = vector.load %arg3[%c0_2, %c0_3, %c0_4] : memref<1x32x32xbf16, #tpu.memory_space<vmem>>, vector<1x32x32xbf16>
    %6 = vector.shape_cast %5 : vector<1x32x32xbf16> to vector<32x32xbf16>
    %cst = arith.constant dense<0.000000e+00> : vector<64x32xf32>
    %7 = tpu.matmul %4, %6, %cst {dimension_numbers = #tpu.dot_dimension_numbers<[1], [0], [0], [1], [0, 0, 1, 1], [], []>} : vector<64x32xbf16>, vector<32x32xbf16>, vector<64x32xf32> -> vector<64x32xf32>
    %c0_5 = arith.constant 0 : index
    %c0_6 = arith.constant 0 : index
    %c0_7 = arith.constant 0 : index
    %8 = vector.load %arg4[%c0_5, %c0_6, %c0_7] : memref<1x32x32xbf16, #tpu.memory_space<vmem>>, vector<1x32x32xbf16>
    %9 = vector.shape_cast %8 : vector<1x32x32xbf16> to vector<32x32xbf16>
    %cst_8 = arith.constant dense<0.000000e+00> : vector<64x32xf32>
    %10 = tpu.matmul %4, %9, %cst_8 {dimension_numbers = #tpu.dot_dimension_numbers<[1], [0], [0], [1], [0, 0, 1, 1], [], []>} : vector<64x32xbf16>, vector<32x32xbf16>, vector<64x32xf32> -> vector<64x32xf32>
    %c0_9 = arith.constant 0 : index
    %c0_10 = arith.constant 0 : index
    %c0_11 = arith.constant 0 : index
    %11 = vector.load %arg5[%c0_9, %c0_10, %c0_11] : memref<1x32x32xbf16, #tpu.memory_space<vmem>>, vector<1x32x32xbf16>
    %12 = vector.shape_cast %11 : vector<1x32x32xbf16> to vector<32x32xbf16>
    %cst_12 = arith.constant dense<0.000000e+00> : vector<64x32xf32>
    %13 = tpu.matmul %4, %12, %cst_12 {dimension_numbers = #tpu.dot_dimension_numbers<[1], [0], [0], [1], [0, 0, 1, 1], [], []>} : vector<64x32xbf16>, vector<32x32xbf16>, vector<64x32xf32> -> vector<64x32xf32>
    %14 = vector.shape_cast %7 : vector<64x32xf32> to vector<8x8x32xf32>
    %15 = arith.truncf %14 : vector<8x8x32xf32> to vector<8x8x32xbf16>
    %16 = vector.shape_cast %10 : vector<64x32xf32> to vector<8x8x32xf32>
    %17 = arith.truncf %16 : vector<8x8x32xf32> to vector<8x8x32xbf16>
    %18 = vector.shape_cast %13 : vector<64x32xf32> to vector<8x8x32xf32>
    %19 = arith.truncf %18 : vector<8x8x32xf32> to vector<8x8x32xbf16>
    "tpu.trace_start"() <{level = 10 : i32, message = "btd,bsd->bts"}> : () -> ()
    %cst_13 = arith.constant dense<0.000000e+00> : vector<8x8x8xf32>
    %20 = tpu.matmul %15, %17, %cst_13 {dimension_numbers = #tpu.dot_dimension_numbers<[2], [2], [1], [1], [0, 0, 0, 1, 1, 1], [0], [0]>} : vector<8x8x32xbf16>, vector<8x8x32xbf16>, vector<8x8x8xf32> -> vector<8x8x8xf32>
    "tpu.trace_stop"() : () -> ()
    %cst_14 = arith.constant dense<0xFF800000> : vector<8x8xf32>
    %21 = vector.multi_reduction <maximumf>, %20, %cst_14 [2] : vector<8x8x8xf32> to vector<8x8xf32>
    %22 = vector.shape_cast %21 : vector<8x8xf32> to vector<8x8x1xf32>
    %23 = vector.broadcast %22 : vector<8x8x1xf32> to vector<8x8x8xf32>
    %24 = arith.subf %20, %23 : vector<8x8x8xf32>
    %25 = math.exp %24 : vector<8x8x8xf32>
    %cst_15 = arith.constant dense<0.000000e+00> : vector<8x8xf32>
    %26 = vector.multi_reduction <add>, %25, %cst_15 [2] : vector<8x8x8xf32> to vector<8x8xf32>
    %27 = vector.shape_cast %26 : vector<8x8xf32> to vector<8x8x1xf32>
    %cst_16 = arith.constant 5.65685415 : f32
    %28 = vector.broadcast %cst_16 : f32 to vector<8x8x1xf32>
    %29 = arith.mulf %27, %28 : vector<8x8x1xf32>
    %30 = tpu.reciprocal %29 {approx = true} : vector<8x8x1xf32> -> vector<8x8x1xf32>
    %31 = vector.broadcast %30 : vector<8x8x1xf32> to vector<8x8x8xf32>
    %32 = arith.mulf %25, %31 : vector<8x8x8xf32>
    %33 = arith.truncf %32 : vector<8x8x8xf32> to vector<8x8x8xbf16>
    "tpu.trace_start"() <{level = 10 : i32, message = "bts,bsd->btd"}> : () -> ()
    %cst_17 = arith.constant dense<0.000000e+00> : vector<8x8x32xf32>
    %34 = tpu.matmul %33, %19, %cst_17 {dimension_numbers = #tpu.dot_dimension_numbers<[2], [1], [1], [2], [0, 0, 0, 1, 1, 2], [0], [0]>} : vector<8x8x8xbf16>, vector<8x8x32xbf16>, vector<8x8x32xf32> -> vector<8x8x32xf32>
    "tpu.trace_stop"() : () -> ()
    %35 = vector.shape_cast %34 : vector<8x8x32xf32> to vector<64x32xf32>
    %36 = arith.addf %35, %3 : vector<64x32xf32>
    %cst_18 = arith.constant dense<0.000000e+00> : vector<64xf32>
    %37 = vector.multi_reduction <add>, %36, %cst_18 [1] : vector<64x32xf32> to vector<64xf32>
    %38 = vector.shape_cast %37 : vector<64xf32> to vector<64x1xf32>
    %cst_19 = arith.constant 3.200000e+01 : f32
    %39 = vector.broadcast %cst_19 : f32 to vector<64x1xf32>
    %40 = arith.divf %38, %39 : vector<64x1xf32>
    %41 = vector.broadcast %40 : vector<64x1xf32> to vector<64x32xf32>
    %42 = arith.subf %36, %41 : vector<64x32xf32>
    %43 = arith.mulf %42, %42 : vector<64x32xf32>
    %cst_20 = arith.constant dense<0.000000e+00> : vector<64xf32>
    %44 = vector.multi_reduction <add>, %43, %cst_20 [1] : vector<64x32xf32> to vector<64xf32>
    %45 = vector.shape_cast %44 : vector<64xf32> to vector<64x1xf32>
    %cst_21 = arith.constant 3.200000e+01 : f32
    %46 = vector.broadcast %cst_21 : f32 to vector<64x1xf32>
    %47 = arith.divf %45, %46 : vector<64x1xf32>
    %48 = vector.broadcast %40 : vector<64x1xf32> to vector<64x32xf32>
    %49 = arith.subf %36, %48 : vector<64x32xf32>
    %cst_22 = arith.constant 9.99999974E-6 : f32
    %50 = vector.broadcast %cst_22 : f32 to vector<64x1xf32>
    %51 = arith.addf %47, %50 : vector<64x1xf32>
    %52 = math.rsqrt %51 : vector<64x1xf32>
    %53 = vector.broadcast %52 : vector<64x1xf32> to vector<64x32xf32>
    %54 = arith.mulf %49, %53 : vector<64x32xf32>
    %c0_23 = arith.constant 0 : index
    %c0_24 = arith.constant 0 : index
    %c0_25 = arith.constant 0 : index
    %55 = vector.load %arg6[%c0_23, %c0_24, %c0_25] : memref<1x1x32xf32, #tpu.memory_space<vmem>>, vector<1x1x32xf32>
    %56 = vector.shape_cast %55 : vector<1x1x32xf32> to vector<1x32xf32>
    %57 = vector.broadcast %56 : vector<1x32xf32> to vector<64x32xf32>
    %58 = arith.mulf %54, %57 : vector<64x32xf32>
    %c0_26 = arith.constant 0 : index
    %c0_27 = arith.constant 0 : index
    %c0_28 = arith.constant 0 : index
    %59 = vector.load %arg7[%c0_26, %c0_27, %c0_28] : memref<1x1x32xf32, #tpu.memory_space<vmem>>, vector<1x1x32xf32>
    %60 = vector.shape_cast %59 : vector<1x1x32xf32> to vector<1x32xf32>
    %61 = vector.broadcast %60 : vector<1x32xf32> to vector<64x32xf32>
    %62 = arith.addf %58, %61 : vector<64x32xf32>
    %63 = arith.truncf %62 : vector<64x32xf32> to vector<64x32xbf16>
    %c0_29 = arith.constant 0 : index
    %c0_30 = arith.constant 0 : index
    %c0_31 = arith.constant 0 : index
    %64 = vector.load %arg8[%c0_29, %c0_30, %c0_31] : memref<1x32x128xbf16, #tpu.memory_space<vmem>>, vector<1x32x128xbf16>
    %65 = vector.shape_cast %64 : vector<1x32x128xbf16> to vector<32x128xbf16>
    %cst_32 = arith.constant dense<0.000000e+00> : vector<64x128xf32>
    %66 = tpu.matmul %63, %65, %cst_32 {dimension_numbers = #tpu.dot_dimension_numbers<[1], [0], [0], [1], [0, 0, 1, 1], [], []>} : vector<64x32xbf16>, vector<32x128xbf16>, vector<64x128xf32> -> vector<64x128xf32>
    %c0_33 = arith.constant 0 : index
    %c0_34 = arith.constant 0 : index
    %c0_35 = arith.constant 0 : index
    %67 = vector.load %arg9[%c0_33, %c0_34, %c0_35] : memref<1x1x128xf32, #tpu.memory_space<vmem>>, vector<1x1x128xf32>
    %68 = vector.shape_cast %67 : vector<1x1x128xf32> to vector<1x128xf32>
    %69 = vector.broadcast %68 : vector<1x128xf32> to vector<64x128xf32>
    %70 = arith.addf %66, %69 : vector<64x128xf32>
    %cst_36 = arith.constant 0.000000e+00 : f32
    %71 = vector.broadcast %cst_36 : f32 to vector<64x128xf32>
    %72 = arith.maximumf %70, %71 : vector<64x128xf32>
    %73 = arith.truncf %72 : vector<64x128xf32> to vector<64x128xbf16>
    %c0_37 = arith.constant 0 : index
    %c0_38 = arith.constant 0 : index
    %c0_39 = arith.constant 0 : index
    %74 = vector.load %arg10[%c0_37, %c0_38, %c0_39] : memref<1x128x32xbf16, #tpu.memory_space<vmem>>, vector<1x128x32xbf16>
    %75 = vector.shape_cast %74 : vector<1x128x32xbf16> to vector<128x32xbf16>
    %cst_40 = arith.constant dense<0.000000e+00> : vector<64x32xf32>
    %76 = tpu.matmul %73, %75, %cst_40 {dimension_numbers = #tpu.dot_dimension_numbers<[1], [0], [0], [1], [0, 0, 1, 1], [], []>} : vector<64x128xbf16>, vector<128x32xbf16>, vector<64x32xf32> -> vector<64x32xf32>
    %c0_41 = arith.constant 0 : index
    %c0_42 = arith.constant 0 : index
    %c0_43 = arith.constant 0 : index
    %77 = vector.load %arg11[%c0_41, %c0_42, %c0_43] : memref<1x1x32xf32, #tpu.memory_space<vmem>>, vector<1x1x32xf32>
    %78 = vector.shape_cast %77 : vector<1x1x32xf32> to vector<1x32xf32>
    %79 = vector.broadcast %78 : vector<1x32xf32> to vector<64x32xf32>
    %80 = arith.addf %76, %79 : vector<64x32xf32>
    %81 = arith.addf %80, %62 : vector<64x32xf32>
    %cst_44 = arith.constant dense<0.000000e+00> : vector<64xf32>
    %82 = vector.multi_reduction <add>, %81, %cst_44 [1] : vector<64x32xf32> to vector<64xf32>
    %83 = vector.shape_cast %82 : vector<64xf32> to vector<64x1xf32>
    %cst_45 = arith.constant 3.200000e+01 : f32
    %84 = vector.broadcast %cst_45 : f32 to vector<64x1xf32>
    %85 = arith.divf %83, %84 : vector<64x1xf32>
    %86 = vector.broadcast %85 : vector<64x1xf32> to vector<64x32xf32>
    %87 = arith.subf %81, %86 : vector<64x32xf32>
    %88 = arith.mulf %87, %87 : vector<64x32xf32>
    %cst_46 = arith.constant dense<0.000000e+00> : vector<64xf32>
    %89 = vector.multi_reduction <add>, %88, %cst_46 [1] : vector<64x32xf32> to vector<64xf32>
    %90 = vector.shape_cast %89 : vector<64xf32> to vector<64x1xf32>
    %cst_47 = arith.constant 3.200000e+01 : f32
    %91 = vector.broadcast %cst_47 : f32 to vector<64x1xf32>
    %92 = arith.divf %90, %91 : vector<64x1xf32>
    %93 = vector.broadcast %85 : vector<64x1xf32> to vector<64x32xf32>
    %94 = arith.subf %81, %93 : vector<64x32xf32>
    %cst_48 = arith.constant 9.99999974E-6 : f32
    %95 = vector.broadcast %cst_48 : f32 to vector<64x1xf32>
    %96 = arith.addf %92, %95 : vector<64x1xf32>
    %97 = math.rsqrt %96 : vector<64x1xf32>
    %98 = vector.broadcast %97 : vector<64x1xf32> to vector<64x32xf32>
    %99 = arith.mulf %94, %98 : vector<64x32xf32>
    %c0_49 = arith.constant 0 : index
    %c0_50 = arith.constant 0 : index
    %c0_51 = arith.constant 0 : index
    %100 = vector.load %arg12[%c0_49, %c0_50, %c0_51] : memref<1x1x32xf32, #tpu.memory_space<vmem>>, vector<1x1x32xf32>
    %101 = vector.shape_cast %100 : vector<1x1x32xf32> to vector<1x32xf32>
    %102 = vector.broadcast %101 : vector<1x32xf32> to vector<64x32xf32>
    %103 = arith.mulf %99, %102 : vector<64x32xf32>
    %c0_52 = arith.constant 0 : index
    %c0_53 = arith.constant 0 : index
    %c0_54 = arith.constant 0 : index
    %104 = vector.load %arg13[%c0_52, %c0_53, %c0_54] : memref<1x1x32xf32, #tpu.memory_space<vmem>>, vector<1x1x32xf32>
    %105 = vector.shape_cast %104 : vector<1x1x32xf32> to vector<1x32xf32>
    %106 = vector.broadcast %105 : vector<1x32xf32> to vector<64x32xf32>
    %107 = arith.addf %103, %106 : vector<64x32xf32>
    %c0_55 = arith.constant 0 : index
    %c0_56 = arith.constant 0 : index
    %108 = vector.load %arg17[%c0_55, %c0_56] : memref<64x32xf32, #tpu.memory_space<vmem>>, vector<64x32xf32>
    tpu.vector_store %arg17[%c0_55, %c0_56], %107 {strides = array<i32>} : memref<64x32xf32, #tpu.memory_space<vmem>>, vector<64x32xf32>,
    %c1_i32 = arith.constant 1 : i32
    %109 = arith.cmpi eq, %arg1, %c1_i32 : i32
    %110 = arith.extui %109 : i1 to i32
    %c0_i32_57 = arith.constant 0 : i32
    %111 = arith.cmpi ne, %110, %c0_i32_57 : i32
    scf.if %111 {
      %112 = vector.shape_cast %107 : vector<64x32xf32> to vector<8x8x32xf32>
      %cst_58 = arith.constant dense<0xFF800000> : vector<8x32xf32>
      %113 = vector.multi_reduction <maximumf>, %112, %cst_58 [1] : vector<8x8x32xf32> to vector<8x32xf32>
      %114 = arith.truncf %113 : vector<8x32xf32> to vector<8x32xbf16>
      %c0_59 = arith.constant 0 : index
      %c0_60 = arith.constant 0 : index
      %115 = vector.load %arg14[%c0_59, %c0_60] : memref<32x128xbf16, #tpu.memory_space<vmem>>, vector<32x128xbf16>
      %cst_61 = arith.constant dense<0.000000e+00> : vector<8x128xf32>
      %116 = tpu.matmul %114, %115, %cst_61 {dimension_numbers = #tpu.dot_dimension_numbers<[1], [0], [0], [1], [0, 0, 1, 1], [], []>} : vector<8x32xbf16>, vector<32x128xbf16>, vector<8x128xf32> -> vector<8x128xf32>
      %c0_62 = arith.constant 0 : index
      %c0_63 = arith.constant 0 : index
      %117 = vector.load %arg15[%c0_62, %c0_63] : memref<1x128xf32, #tpu.memory_space<vmem>>, vector<1x128xf32>
      %118 = vector.broadcast %117 : vector<1x128xf32> to vector<8x128xf32>
      %119 = arith.addf %116, %118 : vector<8x128xf32>
      %cst_64 = arith.constant dense<0xFF800000> : vector<8xf32>
      %120 = vector.multi_reduction <maximumf>, %119, %cst_64 [1] : vector<8x128xf32> to vector<8xf32>
      %121 = vector.shape_cast %120 : vector<8xf32> to vector<8x1xf32>
      %122 = vector.broadcast %121 : vector<8x1xf32> to vector<8x128xf32>
      %123 = arith.subf %119, %122 : vector<8x128xf32>
      %124 = math.exp %123 : vector<8x128xf32>
      %cst_65 = arith.constant dense<0.000000e+00> : vector<8xf32>
      %125 = vector.multi_reduction <add>, %124, %cst_65 [1] : vector<8x128xf32> to vector<8xf32>
      %126 = vector.shape_cast %125 : vector<8xf32> to vector<8x1xf32>
      %127 = math.log %126 : vector<8x1xf32>
      %128 = vector.broadcast %127 : vector<8x1xf32> to vector<8x128xf32>
      %129 = arith.subf %123, %128 : vector<8x128xf32>
      %c0_66 = arith.constant 0 : index
      %c0_67 = arith.constant 0 : index
      %130 = vector.load %arg16[%c0_66, %c0_67] : memref<8x128xf32, #tpu.memory_space<vmem>>, vector<8x128xf32>
      tpu.vector_store %arg16[%c0_66, %c0_67], %129 {strides = array<i32>} : memref<8x128xf32, #tpu.memory_space<vmem>>, vector<8x128xf32>,
    } else {
    }
    return
  }
  func.func @transform_0(%arg0: i32, %arg1: i32) -> (i32, i32) {
    %c0_i32 = arith.constant 0 : i32
    %c0_i32_0 = arith.constant 0 : i32
    return %arg0, %c0_i32 : i32, i32
  }
  func.func @transform_1(%arg0: i32, %arg1: i32) -> (i32, i32, i32) {
    %c0_i32 = arith.constant 0 : i32
    %c0_i32_0 = arith.constant 0 : i32
    %c0_i32_1 = arith.constant 0 : i32
    return %arg1, %c0_i32, %c0_i32_0 : i32, i32, i32
  }
  func.func @transform_2(%arg0: i32, %arg1: i32) -> (i32, i32, i32) {
    %c0_i32 = arith.constant 0 : i32
    %c0_i32_0 = arith.constant 0 : i32
    %c0_i32_1 = arith.constant 0 : i32
    return %arg1, %c0_i32, %c0_i32_0 : i32, i32, i32
  }
  func.func @transform_3(%arg0: i32, %arg1: i32) -> (i32, i32, i32) {
    %c0_i32 = arith.constant 0 : i32
    %c0_i32_0 = arith.constant 0 : i32
    %c0_i32_1 = arith.constant 0 : i32
    return %arg1, %c0_i32, %c0_i32_0 : i32, i32, i32
  }
  func.func @transform_4(%arg0: i32, %arg1: i32) -> (i32, i32, i32) {
    %c0_i32 = arith.constant 0 : i32
    %c0_i32_0 = arith.constant 0 : i32
    %c0_i32_1 = arith.constant 0 : i32
    return %arg1, %c0_i32, %c0_i32_0 : i32, i32, i32
  }
  func.func @transform_5(%arg0: i32, %arg1: i32) -> (i32, i32, i32) {
    %c0_i32 = arith.constant 0 : i32
    %c0_i32_0 = arith.constant 0 : i32
    %c0_i32_1 = arith.constant 0 : i32
    return %arg1, %c0_i32, %c0_i32_0 : i32, i32, i32
  }
  func.func @transform_6(%arg0: i32, %arg1: i32) -> (i32, i32, i32) {
    %c0_i32 = arith.constant 0 : i32
    %c0_i32_0 = arith.constant 0 : i32
    %c0_i32_1 = arith.constant 0 : i32
    return %arg1, %c0_i32, %c0_i32_0 : i32, i32, i32
  }
  func.func @transform_7(%arg0: i32, %arg1: i32) -> (i32, i32, i32) {
    %c0_i32 = arith.constant 0 : i32
    %c0_i32_0 = arith.constant 0 : i32
    %c0_i32_1 = arith.constant 0 : i32
    return %arg1, %c0_i32, %c0_i32_0 : i32, i32, i32
  }
  func.func @transform_8(%arg0: i32, %arg1: i32) -> (i32, i32, i32) {
    %c0_i32 = arith.constant 0 : i32
    %c0_i32_0 = arith.constant 0 : i32
    %c0_i32_1 = arith.constant 0 : i32
    return %arg1, %c0_i32, %c0_i32_0 : i32, i32, i32
  }
  func.func @transform_9(%arg0: i32, %arg1: i32) -> (i32, i32, i32) {
    %c0_i32 = arith.constant 0 : i32
    %c0_i32_0 = arith.constant 0 : i32
    %c0_i32_1 = arith.constant 0 : i32
    return %arg1, %c0_i32, %c0_i32_0 : i32, i32, i32
  }
  func.func @transform_10(%arg0: i32, %arg1: i32) -> (i32, i32, i32) {
    %c0_i32 = arith.constant 0 : i32
    %c0_i32_0 = arith.constant 0 : i32
    %c0_i32_1 = arith.constant 0 : i32
    return %arg1, %c0_i32, %c0_i32_0 : i32, i32, i32
  }
  func.func @transform_11(%arg0: i32, %arg1: i32) -> (i32, i32, i32) {
    %c0_i32 = arith.constant 0 : i32
    %c0_i32_0 = arith.constant 0 : i32
    %c0_i32_1 = arith.constant 0 : i32
    return %arg1, %c0_i32, %c0_i32_0 : i32, i32, i32
  }
  func.func @transform_12(%arg0: i32, %arg1: i32) -> (i32, i32) {
    %c0_i32 = arith.constant 0 : i32
    %c0_i32_0 = arith.constant 0 : i32
    %c0_i32_1 = arith.constant 0 : i32
    return %c0_i32, %c0_i32_0 : i32, i32
  }
  func.func @transform_13(%arg0: i32, %arg1: i32) -> (i32, i32) {
    %c0_i32 = arith.constant 0 : i32
    %c0_i32_0 = arith.constant 0 : i32
    %c0_i32_1 = arith.constant 0 : i32
    return %c0_i32, %c0_i32_0 : i32, i32
  }
  func.func @transform_14(%arg0: i32, %arg1: i32) -> (i32, i32) {
    %c0_i32 = arith.constant 0 : i32
    %c0_i32_0 = arith.constant 0 : i32
    return %arg0, %c0_i32 : i32, i32
  }
}

</mosaic_0001>

<bundles_post_ra>
// kernel: tpu_custom_call.1
= control target key start
LH: loop header
LB: loop body
LE: loop exit
PB: predicated region body
PF: predicated region fallthrough
CT: control target
= control target key end

     0   :  { %s3171_s0 = inlined_call_operand.vmem [shape: f32[64,32], index: 0, kind: input, shape index: {}]   ;;  %s3172_s1 = inlined_call_operand.vmem [shape: bf16[2,32,32], index: 1, kind: input, shape index: {}]   ;;  %s3173_s2 = inlined_call_operand.vmem [shape: bf16[2,32,32], index: 2, kind: input, shape index: {}]   ;;  %s3174_s3 = inlined_call_operand.vmem [shape: bf16[2,32,32], index: 3, kind: input, shape index: {}]   ;;  %s3175_s4 = inlined_call_operand.vmem [shape: f32[2,1,32], index: 4, kind: input, shape index: {}]   ;;  %s3176_s5 = inlined_call_operand.vmem [shape: f32[2,1,32], index: 5, kind: input, shape index: {}]   ;;  %s3177_s6 = inlined_call_operand.vmem [shape: bf16[2,32,128], index: 6, kind: input, shape index: {}]   ;;  %s3178_s7 = inlined_call_operand.vmem [shape: f32[2,1,128], index: 7, kind: input, shape index: {}]   ;;  %s3179_s8 = inlined_call_operand.vmem [shape: bf16[2,128,32], index: 8, kind: input, shape index: {}]   ;;  %s3180_s9 = inlined_call_operand.vmem [shape: f32[2,1,32], index: 9, kind: input, shape index: {}]   ;;  %s3181_s10 = inlined_call_operand.vmem [shape: f32[2,1,32], index: 10, kind: input, shape index: {}]   ;;  %s3182_s11 = inlined_call_operand.vmem [shape: f32[2,1,32], index: 11, kind: input, shape index: {}]   ;;  %s3183_s12 = inlined_call_operand.vmem [shape: bf16[32,128], index: 12, kind: input, shape index: {}]   ;;  %s3184_s13 = inlined_call_operand.vmem [shape: f32[1,128], index: 13, kind: input, shape index: {}]   ;;  %s3185_s14 = inlined_call_operand.hbm [shape: f32[8,128], index: 14, kind: output, shape index: {}]  }
   0x1   :  { %3189 = sst [smem:[#allocation9_spill]] %s3172_s1 }
   0x2   :  { %3190 = sst [smem:[#allocation10_spill]] %s3173_s2 }
   0x3   :  { %3191 = sst [smem:[#allocation11_spill]] %s3174_s3 }
   0x4   :  { %3192 = sst [smem:[#allocation12_spill]] %s3183_s12 }
   0x5   :  { %3193 = sst [smem:[#allocation13_spill]] %s3184_s13 }
   0x6   :  { %3194 = sst [smem:[#allocation14_spill]] %s3185_s14 }
   0x7   :  { %19 = vsyncpa [#allocation4], 0  ;;  %s2597_s29 = smov 0   ;;  %s2599_s30 = smov 0  }
   0x8   :  { %s2601_s15 = smov 0  }
   0x9 LB: > { %3195 = sst [smem:[#allocation6_spill]] %s2514_s30  ;;  %s34_s17 = sadd.s32 1, %s2514_s30  ;;  %s2518_s15 = sphi %s2601_s15, %s25_s15   ;;  %s2514_s30 = sphi %s2599_s30, %s3210_s30   ;;  %s2510_s29 = sphi %s2597_s29, %s3209_s29  }
   0xa   : > { %3196 = sst [smem:[#allocation7_spill]] %s2518_s15  ;;  %p35_p0 = scmp.ge.s32.totalorder %s34_s17, 2 }
   0xb   : > { %p2206_p1 = scmp.ge.s32.totalorder %s2518_s15, 1  ;;  %p524_p2 = scmp.lt.s32.totalorder %s2518_s15, 3 }
   0xc   : > { %s3212_s17 = smov (%p35_p0, %s34_s17), 0 }
   0xd   : > { %3197 = sst [smem:[#allocation8_spill]] %s3212_s17  ;;  %p525_p3 = pnand %p2206_p1, %p524_p2 }
   0xe   : > { %p614_p4 = scmp.lt.s32.totalorder (!%p525_p3), %s2510_s29, 1  ;;  %s3198_s1 = sld [smem:[#allocation9_spill]] (!%p525_p3) }
   0xf   : > { %528 = sbr.rel (%p525_p3) target bundleno = 2073 (0x819), region = 76  ;;  %s3199_s2 = sld [smem:[#allocation10_spill]] (!%p525_p3) }
  0x10   : > { %s3200_s3 = sld [smem:[#allocation11_spill]] (!%p525_p3)  ;;  %p2217_p5 = scmp.ne.s32.totalorder (!%p525_p3), %s2510_s29, 0 }
  0x14   : > { %s2620_s18 = scalar_select %p614_p4, %s2510_s29, 1 }
  0x16   : > { %s2328_s19 = sshll.u32 %s2620_s18, 4  ;;  %s642_s26 = scalar_lea.vmem %s3178_s7, %s2620_s18 }
  0x17   : > { %s2630_s25 = scalar_lea.vmem %s3198_s1, %s2328_s19  ;;  %s2635_s28 = scalar_lea.vmem %s3199_s2, %s2328_s19 }
  0x18   : > { %s2640_s30 = scalar_lea.vmem %s3200_s3, %s2328_s19  ;;  %s2649_s23 = scalar_lea.vmem %s3177_s6, %s2328_s19 }
  0x19   : > { %s2332_s27 = sshll.u32 %s2620_s18, 6  ;;  %s650_s16 = scalar_lea.vmem %s3180_s9, %s2620_s18 }
  0x1a   : > { %s2663_s12 = scalar_lea.vmem %s3179_s8, %s2332_s27  ;;  %s653_s22 = scalar_lea.vmem %s3181_s10, %s2620_s18 }
  0x1b   : > { %s656_s20 = scalar_lea.vmem %s3182_s11, %s2620_s18  ;;  %661 = sbr.rel (%p2217_p5) target bundleno = 41 (0x29), region = 80 }
  0x20   : > { %v662_v0 = vld [vmem:[%s3171_s0] sm:$0xff]  ;;  %vm670_vm0 = vcmask 261120   ;;  %v663_v1 = vld [vmem:[%s3171_s0 + $0x8] sm:$0xff]  ;;  %v664_v2 = vld [vmem:[%s3171_s0 + $0x10] sm:$0xff] }
  0x21   : > { %671 = vst.msk [vmem:[#allocation2] sm:$0xff] %vm670_vm0, %v662_v0  ;;  %v665_v3 = vld [vmem:[%s3171_s0 + $0x18] sm:$0xff]  ;;  %v666_v4 = vld [vmem:[%s3171_s0 + $0x20] sm:$0xff]  ;;  %v667_v5 = vld [vmem:[%s3171_s0 + $0x28] sm:$0xff] }
  0x22   : > { %672 = vst.msk [vmem:[#allocation2 + $0x8] sm:$0xff] %vm670_vm0, %v663_v1  ;;  %v668_v6 = vld [vmem:[%s3171_s0 + $0x30] sm:$0xff]  ;;  %v669_v7 = vld [vmem:[%s3171_s0 + $0x38] sm:$0xff] }
  0x23   : > { %673 = vst.msk [vmem:[#allocation2 + $0x10] sm:$0xff] %vm670_vm0, %v664_v2 }
  0x24   : > { %674 = vst.msk [vmem:[#allocation2 + $0x18] sm:$0xff] %vm670_vm0, %v665_v3 }
  0x25   : > { %675 = vst.msk [vmem:[#allocation2 + $0x20] sm:$0xff] %vm670_vm0, %v666_v4 }
  0x26   : > { %676 = vst.msk [vmem:[#allocation2 + $0x28] sm:$0xff] %vm670_vm0, %v667_v5 }
  0x27   : > { %677 = vst.msk [vmem:[#allocation2 + $0x30] sm:$0xff] %vm670_vm0, %v668_v6 }
  0x28   : > { %678 = vst.msk [vmem:[#allocation2 + $0x38] sm:$0xff] %vm670_vm0, %v669_v7 }
  0x29 PF: > { %v2336_v8 = vld [vmem:[%s2635_s28 + $0x8] sm:$0xff]  ;;  %v2335_v9 = vld [vmem:[%s2635_s28] sm:$0xff]  ;;  %vm707_vm1 = vcmask 261120   ;;  %vm1015_vm2 = vcmask 64512   ;;  %vm1123_vm3 = vcmask 1043456   ;;  %s3201_s28 = scalar_lea.vmem %s3175_s4, %s2620_s18  ;;  %s3202_s17 = scalar_lea.vmem %s3176_s5, %s2620_s18 }
  0x2a   : > { %v2700_v10 = vld [vmem:[#allocation2] sm:$0xff]  ;;  %v2702_v11 = vld [vmem:[#allocation2 + $0x8] sm:$0xff]  ;;  %771 = vmatpush.bf16.msra.mxu1 %v2336_v8  ;;  %2353 = vmatpush.bf16.msra.mxu2 %v2336_v8  ;;  %v2704_v12 = vld [vmem:[#allocation2 + $0x10] sm:$0xff]  ;;  %p2314_p6 = scmp.ne.s32.totalorder %s2510_s29, 1 }
  0x2b   : > { %v2706_v13 = vld [vmem:[#allocation2 + $0x18] sm:$0xff]  ;;  %v2334_v14 = vld [vmem:[%s2630_s25 + $0x8] sm:$0xff]  ;;  %v2333_v15 = vld [vmem:[%s2630_s25] sm:$0xff]  ;;  %v2712_v16 = vpack.c.bf16 %v2702_v11, %v2700_v10  ;;  %s3204_s13 = sld [smem:[#allocation13_spill]] (!%p2314_p6) }
  0x2c   : > { %726 = vmatpush.bf16.msra.mxu0 %v2334_v14  ;;  %2351 = vmatpush.bf16.msra.mxu3 %v2334_v14  ;;  %v2716_v17 = vpack.c.bf16 %v2706_v13, %v2704_v12  ;;  %v2726_v18 = vld [vmem:[#allocation2 + $0x20] sm:$0xff] }
  0x2d   : > { %v2728_v19 = vld [vmem:[#allocation2 + $0x28] sm:$0xff] }
  0x2e   : > { %772 = vmatpush.bf16.msra.mxu1 %v2335_v9  ;;  %2354 = vmatpush.bf16.msra.mxu2 %v2335_v9  ;;  %v2732_v20 = vpack.c.bf16 %v2728_v19, %v2726_v18  ;;  %v2738_v21 = vld [vmem:[#allocation2 + $0x30] sm:$0xff] }
  0x2f   : > { %v2740_v22 = vld [vmem:[#allocation2 + $0x38] sm:$0xff] }
  0x30   : > { %727 = vmatpush.bf16.msra.mxu0 %v2333_v15  ;;  %2352 = vmatpush.bf16.msra.mxu3 %v2333_v15  ;;  %v2744_v23 = vpack.c.bf16 %v2740_v22, %v2738_v21 }
  0x31   : > { %2238 = vmatmul.msk.bf16.vlgmr.msra.gmra.mxu1 %vm707_vm1, %v2712_v16  ;;  %2239 = vmatmul.msk.bf16.vlgmr.msra.gmra.mxu2 %vm707_vm1, %v2716_v17 }
  0x33   : > { %2226 = vmatmul.msk.bf16.vlgmr.msra.gmra.mxu0 %vm707_vm1, %v2712_v16  ;;  %2227 = vmatmul.msk.bf16.vlgmr.msra.gmra.mxu3 %vm707_vm1, %v2716_v17 }
  0x41   : > { %2240 = vmatmul.msk.bf16.gmra.mxu2 %vm707_vm1, %v2732_v20 }
  0x43   : > { %2228 = vmatmul.msk.bf16.gmra.mxu3 %vm707_vm1, %v2732_v20 }
  0x51   : > { %2241 = vmatmul.msk.bf16.gmra.mxu2 %vm707_vm1, %v2744_v23 }
  0x53   : > { %2229 = vmatmul.msk.bf16.gmra.mxu3 %vm707_vm1, %v2744_v23 }
  0xae   : > { %v774_v24 = vpop.f32.mrf.mxu1 }
  0xaf   : > { %v847_v25 = vpack.c.bf16 %v774_v24, %v774_v24 }
  0xb0   : > { %v729_v28 = vpop.f32.mrf.mxu0 }
  0xb1   : > { %v867_v26 = vsel %vm707_vm1, %v847_v25, 0  ;;  %v839_v30 = vpack.c.bf16 %v729_v28, %v729_v28  ;;  %v2338_v28 = vld [vmem:[%s2640_s30 + $0x8] sm:$0xff] }
  0xb2   : > { %876 = vmatpush.bf16.xpose.msrb.mxu3 %v867_v26  ;;  %816 = vmatpush.bf16.msrb.mxu2 %v2338_v28 }
  0xb4   : > { %v779_v27 = vpop.f32.mrf.mxu2 }
  0xb5   : > { %v849_v29 = vpack.c.bf16 %v779_v27, %v779_v27 }
  0xb6   : > { %v776_v31 = vpop.f32.mrf.mxu1  ;;  %v734_v32 = vpop.f32.mrf.mxu3 }
  0xb7   : > { %v848_v33 = vpack.c.bf16 %v776_v31, %v776_v31  ;;  %v905_v34 = vsel %vm707_vm1, %v849_v29, 0  ;;  %v841_v53 = vpack.c.bf16 %v734_v32, %v734_v32  ;;  %v2337_v29 = vld [vmem:[%s2640_s30] sm:$0xff] }
  0xb8   : > { %v731_v40 = vpop.f32.mrf.mxu0  ;;  %817 = vmatpush.bf16.msrb.mxu2 %v2337_v29 }
  0xb9   : > { %v886_v35 = vsel %vm707_vm1, %v848_v33, 0  ;;  %2254 = vmatmul.msk.bf16.vlgmr.msrb.gmra.mxu3 %vm707_vm1, %v839_v30  ;;  %v840_v44 = vpack.c.bf16 %v731_v40, %v731_v40 }
  0xba   : > { %895 = vmatpush.bf16.xpose.msra.mxu3 %v886_v35 }
  0xbb   : > { %2250 = vmatmul.msk.bf16.vlgmr.msrb.gmra.mxu2 %vm707_vm1, %v2712_v16 }
  0xbc   : > { %v781_v36 = vpop.f32.mrf.mxu2 }
  0xbd   : > { %v850_v38 = vpack.c.bf16 %v781_v36, %v781_v36 }
  0xbe   : > { %v736_v37 = vpop.f32.mrf.mxu3 }
  0xbf   : > { %v924_v43 = vsel %vm707_vm1, %v850_v38, 0  ;;  %v842_v61 = vpack.c.bf16 %v736_v37, %v736_v37 }
  0xc2   : > { %914 = vmatpush.bf16.xpose.msrb.mxu3 %v905_v34 }
  0xc4   : > { %v784_v39 = vpop.f32.mrf.mxu2 }
  0xc5   : > { %v851_v41 = vpack.c.bf16 %v784_v39, %v784_v39 }
  0xc6   : > { %v739_v42 = vpop.f32.mrf.mxu3 }
  0xc7   : > { %v943_v45 = vsel %vm707_vm1, %v851_v41, 0  ;;  %v843_v46 = vpack.c.bf16 %v739_v42, %v739_v42 }
  0xc8   : > { %952 = vmatpush.bf16.xpose.msrb.mxu0 %v943_v45 }
  0xc9   : > { %2255 = vmatmul.msk.bf16.vlgmr.msra.gmra.mxu3 %vm707_vm1, %v840_v44 }
  0xca   : > { %933 = vmatpush.bf16.xpose.msra.mxu3 %v924_v43 }
  0xcb   : > { %2251 = vmatmul.msk.bf16.gmra.mxu2 %vm707_vm1, %v2716_v17 }
  0xcc   : > { %v786_v47 = vpop.f32.mrf.mxu2 }
  0xcd   : > { %v852_v48 = vpack.c.bf16 %v786_v47, %v786_v47 }
  0xce   : > { %v741_v49 = vpop.f32.mrf.mxu3 }
  0xcf   : > { %2258 = vmatmul.msk.bf16.vlgmr.msrb.gmra.mxu0 %vm707_vm1, %v843_v46  ;;  %v962_v50 = vsel %vm707_vm1, %v852_v48, 0  ;;  %v844_v51 = vpack.c.bf16 %v741_v49, %v741_v49 }
  0xd0   : > { %971 = vmatpush.bf16.xpose.msrb.mxu1 %v962_v50 }
  0xd4   : > { %v789_v52 = vpop.f32.mrf.mxu2 }
  0xd5   : > { %v853_v54 = vpack.c.bf16 %v789_v52, %v789_v52 }
  0xd6   : > { %v744_v56 = vpop.f32.mrf.mxu3 }
  0xd7   : > { %v981_v55 = vsel %vm707_vm1, %v853_v54, 0  ;;  %2259 = vmatmul.msk.bf16.vlgmr.msrb.gmra.mxu1 %vm707_vm1, %v844_v51  ;;  %v845_v57 = vpack.c.bf16 %v744_v56, %v744_v56 }
  0xd8   : > { %990 = vmatpush.bf16.xpose.msra.mxu0 %v981_v55 }
  0xd9   : > { %2256 = vmatmul.msk.bf16.vlgmr.msrb.gmra.mxu3 %vm707_vm1, %v841_v53 }
  0xdb   : > { %2252 = vmatmul.msk.bf16.gmra.mxu2 %vm707_vm1, %v2732_v20 }
  0xdc   : > { %v791_v58 = vpop.f32.mrf.mxu2 }
  0xdd   : > { %v854_v59 = vpack.c.bf16 %v791_v58, %v791_v58 }
  0xde   : > { %v746_v62 = vpop.f32.mrf.mxu3 }
  0xdf   : > { %2260 = vmatmul.msk.bf16.vlgmr.msra.gmra.mxu0 %vm707_vm1, %v845_v57  ;;  %v1000_v60 = vsel %vm707_vm1, %v854_v59, 0  ;;  %v846_v63 = vpack.c.bf16 %v746_v62, %v746_v62 }
  0xe0   : > { %1009 = vmatpush.bf16.xpose.msrb.mxu3 %v1000_v60 }
  0xe9   : > { %2257 = vmatmul.msk.bf16.vlgmr.msra.gmra.mxu3 %vm707_vm1, %v842_v61 }
  0xeb   : > { %2253 = vmatmul.msk.bf16.gmra.mxu2 %vm707_vm1, %v2744_v23 }
  0xf9   : > { %2261 = vmatmul.msk.bf16.vlgmr.msrb.gmra.mxu3 %vm707_vm1, %v846_v63 }
 0x13c   : > { %v878_v0 = vpop.f32.mrf.mxu3 }
 0x13d   : > { %v1016_v1 = vsel %vm1015_vm2, %v878_v0, -inf }
 0x13e   : > { %1017 = vmax.xlane.f32.xlu0 %v1016_v1  ;;  %v819_v1 = vpop.f32.mrf.mxu2 }
 0x144   : > { %v880_v2 = vpop.f32.mrf.mxu3 }
 0x145   : > { %v855_v2 = vpack.c.bf16 %v819_v1, %v819_v1 }
 0x14c   : > { %v897_v3 = vpop.f32.mrf.mxu3  ;;  %v954_v4 = vpop.f32.mrf.mxu0 }
 0x14d   : > { %v1028_v5 = vsel %vm1015_vm2, %v954_v4, -inf  ;;  %v1019_v6 = vsel %vm1015_vm2, %v897_v3, -inf }
 0x14e   : > { %1029 = vmax.xlane.f32.xlu2 %v1028_v5  ;;  %1020 = vmax.xlane.f32.xlu0 %v1019_v6  ;;  %v1125_v5 = vsel %vm1123_vm3, %v855_v2, 0 }
 0x14f   : > { %1134 = vmatpush.bf16.msrb.mxu0 %v1125_v5 }
 0x154   : > { %v899_v7 = vpop.f32.mrf.mxu3  ;;  %v973_v8 = vpop.f32.mrf.mxu1 }
 0x155   : > { %v1031_v9 = vsel %vm1015_vm2, %v973_v8, -inf  ;;  %v956_v14 = vpop.f32.mrf.mxu0 }
 0x156   : > { %1032 = vmax.xlane.f32.xlu2 %v1031_v9 }
 0x15c   : > { %v916_v15 = vpop.f32.mrf.mxu3  ;;  %v975_v24 = vpop.f32.mrf.mxu1 }
 0x15d   : > { %v1022_v25 = vsel %vm1015_vm2, %v916_v15, -inf  ;;  %v2771_v26 = vpop.f32.mrf.mxu0 }
 0x15e   : > { %1023 = vmax.xlane.f32.xlu1 %v1022_v25  ;;  %v1034_v27 = vsel %vm1015_vm2, %v2771_v26, -inf  ;;  %v821_v25 = vpop.f32.mrf.mxu2 }
 0x15f   : > { %1035 = vmax.xlane.f32.xlu0 %v1034_v27 }
 0x164   : > { %v918_v30 = vpop.f32.mrf.mxu3 }
 0x165   : > { %v994_v31 = vpop.f32.mrf.mxu0 }
 0x166   : > { %v824_v28 = vpop.f32.mrf.mxu2 }
 0x167   : > { %v857_v29 = vpack.c.bf16 %v824_v28, %v824_v28 }
 0x169   : > { %v1163_v30 = vsel %vm1123_vm3, %v857_v29, 0 }
 0x16a   : > { %1172 = vmatpush.bf16.msra.mxu2 %v1163_v30 }
 0x16c   : > { %v935_v32 = vpop.f32.mrf.mxu3 }
 0x16d   : > { %v1025_v33 = vsel %vm1015_vm2, %v935_v32, -inf }
 0x16e   : > { %1026 = vmax.xlane.f32.xlu1 %v1025_v33  ;;  %v826_v31 = vpop.f32.mrf.mxu2 }
 0x174   : > { %v937_v34 = vpop.f32.mrf.mxu3 }
 0x17c   : > { %v1011_v35 = vpop.f32.mrf.mxu3 }
 0x17d   : > { %v1037_v36 = vsel %vm1015_vm2, %v1011_v35, -inf }
 0x17e   : > { %1038 = vmax.xlane.f32.xlu1 %v1037_v36  ;;  %v829_v36 = vpop.f32.mrf.mxu2 }
 0x184   : > { %v1013_v37 = vpop.f32.mrf.mxu3 }
 0x185   : > { %v859_v37 = vpack.c.bf16 %v829_v36, %v829_v36 }
 0x1b1   : > { %v1018_v16 = vpop.xlane.xlu0 %1017 }
 0x1b2   : > { %v1040_v38 = vsub.f32 %v878_v0, %v1018_v16  ;;  %v1201_v16 = vsel %vm1123_vm3, %v859_v37, 0 }
 0x1b3   : > { %1210 = vmatpush.bf16.msra.mxu0 %v1201_v16 }
 0x1b4   : > { %v1048_v39 = vmul.f32 1.442695, %v1040_v38 }
 0x1b6   : > { %2393 = vpow2.f32 %v1048_v39 }
 0x1bc   : > { %v2787_v40 = vpop.eup %2393 }
 0x1bd   : > { %v1064_v17 = vsel %vm1015_vm2, %v2787_v40, 0.0 }
 0x1be   : > { %1065 = vadd.xlane.f32.xlu2 %v1064_v17 }
 0x1c1   : > { %v1021_v41 = vpop.xlane.xlu0 %1020  ;;  %v1030_v42 = vpop.xlane.xlu2 %1029 }
 0x1c2   : > { %v1041_v43 = vsub.f32 %v897_v3, %v1021_v41  ;;  %v1044_v45 = vsub.f32 %v954_v4, %v1030_v42  ;;  %v831_v42 = vpop.f32.mrf.mxu2 }
 0x1c4   : > { %v1050_v44 = vmul.f32 1.442695, %v1041_v43  ;;  %v1056_v20 = vmul.f32 1.442695, %v1044_v45 }
 0x1c6   : > { %2395 = vpow2.f32 %v1050_v44  ;;  %v860_v44 = vpack.c.bf16 %v831_v42, %v831_v42 }
 0x1c7   : > { %2397 = vpow2.f32 %v1056_v20 }
 0x1c8   : > { %v1220_v45 = vsel %vm1123_vm3, %v860_v44, 0 }
 0x1c9   : > { %v1033_v47 = vpop.xlane.xlu2 %1032 }
 0x1ca   : > { %v1045_v51 = vsub.f32 %v973_v8, %v1033_v47 }
 0x1cc   : > { %v2791_v46 = vpop.eup %2395  ;;  %v1058_v54 = vmul.f32 1.442695, %v1045_v51 }
 0x1cd   : > { %v1067_v23 = vsel %vm1015_vm2, %v2791_v46, 0.0  ;;  %v2795_v50 = vpop.eup %2397 }
 0x1ce   : > { %1068 = vadd.xlane.f32.xlu0 %v1067_v23  ;;  %v1076_v53 = vsel %vm1015_vm2, %v2795_v50, 0.0 }
 0x1d1   : > { %v1024_v48 = vpop.xlane.xlu1 %1023 }
 0x1d2   : > { %v1042_v49 = vsub.f32 %v916_v15, %v1024_v48  ;;  %v1036_v57 = vpop.xlane.xlu0 %1035 }
 0x1d3   : > { %v1046_v61 = vsub.f32 %v2771_v26, %v1036_v57  ;;  %v856_v26 = vpack.c.bf16 %v821_v25, %v821_v25 }
 0x1d4   : > { %v1052_v52 = vmul.f32 1.442695, %v1042_v49 }
 0x1d5   : > { %v1060_v0 = vmul.f32 1.442695, %v1046_v61  ;;  %v1144_v27 = vsel %vm1123_vm3, %v856_v26, 0 }
 0x1d6   : > { %2399 = vpow2.f32 %v1052_v52  ;;  %1077 = vadd.xlane.f32.xlu0 %v1076_v53  ;;  %1153 = vmatpush.bf16.msra.mxu1 %v1144_v27  ;;  %v834_v52 = vpop.f32.mrf.mxu2 }
 0x1d7   : > { %2401 = vpow2.f32 %v1058_v54  ;;  %v861_v54 = vpack.c.bf16 %v834_v52, %v834_v52 }
 0x1d9   : > { %v1239_v57 = vsel %vm1123_vm3, %v861_v54, 0 }
 0x1da   : > { %1229 = vmatpush.bf16.msrb.mxu1 %v1220_v45  ;;  %1248 = vmatpush.bf16.msrb.mxu2 %v1239_v57 }
 0x1dc   : > { %v2799_v55 = vpop.eup %2399 }
 0x1dd   : > { %v1070_v56 = vsel %vm1015_vm2, %v2799_v55, 0.0  ;;  %v2803_v59 = vpop.eup %2401 }
 0x1de   : > { %1071 = vadd.xlane.f32.xlu1 %v1070_v56  ;;  %v1079_v63 = vsel %vm1015_vm2, %v2803_v59, 0.0 }
 0x1e1   : > { %v1027_v58 = vpop.xlane.xlu1 %1026 }
 0x1e2   : > { %v1043_v60 = vsub.f32 %v935_v32, %v1027_v58  ;;  %v858_v32 = vpack.c.bf16 %v826_v31, %v826_v31 }
 0x1e4   : > { %v1054_v62 = vmul.f32 1.442695, %v1043_v60  ;;  %v1182_v33 = vsel %vm1123_vm3, %v858_v32, 0 }
 0x1e5   : > { %1191 = vmatpush.bf16.msra.mxu3 %v1182_v33 }
 0x1e6   : > { %2403 = vpow2.f32 %v1054_v62  ;;  %1080 = vadd.xlane.f32.xlu1 %v1079_v63  ;;  %v836_v62 = vpop.f32.mrf.mxu2 }
 0x1e7   : > { %2405 = vpow2.f32 %v1060_v0  ;;  %v862_v0 = vpack.c.bf16 %v836_v62, %v836_v62 }
 0x1e9   : > { %v1258_v2 = vsel %vm1123_vm3, %v862_v0, 0 }
 0x1ea   : > { %1267 = vmatpush.bf16.msrb.mxu3 %v1258_v2 }
 0x1ec   : > { %v2808_v3 = vpop.eup %2403 }
 0x1ed   : > { %v1073_v4 = vsel %vm1015_vm2, %v2808_v3, 0.0  ;;  %v2813_v7 = vpop.eup %2405 }
 0x1ee   : > { %1074 = vadd.xlane.f32.xlu2 %v1073_v4  ;;  %v1082_v14 = vsel %vm1015_vm2, %v2813_v7, 0.0 }
 0x1f1   : > { %v1039_v6 = vpop.xlane.xlu1 %1038 }
 0x1f2   : > { %v1047_v8 = vsub.f32 %v1011_v35, %v1039_v6 }
 0x1f4   : > { %v1062_v9 = vmul.f32 1.442695, %v1047_v8 }
 0x1f6   : > { %2407 = vpow2.f32 %v1062_v9  ;;  %1083 = vadd.xlane.f32.xlu2 %v1082_v14 }
 0x1fc   : > { %v2817_v15 = vpop.eup %2407 }
 0x1fd   : > { %v1085_v24 = vsel %vm1015_vm2, %v2817_v15, 0.0 }
 0x1fe   : > { %1086 = vadd.xlane.f32.xlu0 %v1085_v24 }
 0x231   : > { %v1066_v34 = vpop.xlane.xlu2 %1065 }
 0x232   : > { %v1088_v35 = vmul.f32 5.656854, %v1066_v34 }
 0x234   : > { %2409 = vrcp.f32 %v1088_v35 }
 0x23a   : > { %v2410_v38 = vpop.eup %2409 }
 0x23b   : > { %v1104_v39 = vmul.f32 %v2410_v38, %v2787_v40 }
 0x23d   : > { %v1112_v17 = vpack.c.bf16 %v1104_v39, %v1104_v39 }
 0x23f   : > { %2262 = vmatmul.msk.bf16.vlgmr.msrb.gmra.mxu0 %vm1015_vm2, %v1112_v17 }
 0x241   : > { %v1069_v41 = vpop.xlane.xlu0 %1068 }
 0x242   : > { %v1089_v43 = vmul.f32 5.656854, %v1069_v41 }
 0x244   : > { %2411 = vrcp.f32 %v1089_v43 }
 0x249   : > { %v1078_v20 = vpop.xlane.xlu0 %1077 }
 0x24a   : > { %v2412_v23 = vpop.eup %2411  ;;  %v1092_v47 = vmul.f32 5.656854, %v1078_v20 }
 0x24b   : > { %v1105_v48 = vmul.f32 %v2412_v23, %v2791_v46 }
 0x24c   : > { %2413 = vrcp.f32 %v1092_v47 }
 0x24d   : > { %v1113_v49 = vpack.c.bf16 %v1105_v48, %v1105_v48 }
 0x24f   : > { %2263 = vmatmul.msk.bf16.vlgmr.msra.gmra.mxu1 %vm1015_vm2, %v1113_v49 }
 0x251   : > { %v1072_v40 = vpop.xlane.xlu1 %1071 }
 0x252   : > { %v1090_v51 = vmul.f32 5.656854, %v1072_v40  ;;  %v2414_v53 = vpop.eup %2413 }
 0x253   : > { %v1108_v56 = vmul.f32 %v2414_v53, %v2795_v50  ;;  %v2520_v53 = vmov 32.0  }
 0x254   : > { %2415 = vrcp.f32 %v1090_v51 }
 0x255   : > { %v1116_v58 = vpack.c.bf16 %v1108_v56, %v1108_v56 }
 0x257   : > { %2266 = vmatmul.msk.bf16.vlgmr.msra.gmra.mxu0 %vm1015_vm2, %v1116_v58 }
 0x259   : > { %v1081_v60 = vpop.xlane.xlu1 %1080 }
 0x25a   : > { %v2416_v46 = vpop.eup %2415  ;;  %v1093_v61 = vmul.f32 5.656854, %v1081_v60 }
 0x25b   : > { %v1106_v63 = vmul.f32 %v2416_v46, %v2799_v55 }
 0x25c   : > { %2417 = vrcp.f32 %v1093_v61 }
 0x25d   : > { %v1114_v1 = vpack.c.bf16 %v1106_v63, %v1106_v63 }
 0x25f   : > { %2264 = vmatmul.msk.bf16.vlgmr.msra.gmra.mxu2 %vm1015_vm2, %v1114_v1 }
 0x261   : > { %v1075_v50 = vpop.xlane.xlu2 %1074 }
 0x262   : > { %v2418_v4 = vpop.eup %2417  ;;  %v1091_v5 = vmul.f32 5.656854, %v1075_v50 }
 0x263   : > { %v1109_v6 = vmul.f32 %v2418_v4, %v2803_v59 }
 0x264   : > { %2419 = vrcp.f32 %v1091_v5 }
 0x265   : > { %v1117_v8 = vpack.c.bf16 %v1109_v6, %v1109_v6 }
 0x267   : > { %2267 = vmatmul.msk.bf16.vlgmr.msrb.gmra.mxu1 %vm1015_vm2, %v1117_v8 }
 0x269   : > { %v1084_v9 = vpop.xlane.xlu2 %1083 }
 0x26a   : > { %v2420_v14 = vpop.eup %2419  ;;  %v1094_v55 = vmul.f32 5.656854, %v1084_v9 }
 0x26b   : > { %v1107_v24 = vmul.f32 %v2420_v14, %v2808_v3 }
 0x26c   : > { %2421 = vrcp.f32 %v1094_v55 }
 0x26d   : > { %v1115_v25 = vpack.c.bf16 %v1107_v24, %v1107_v24 }
 0x26f   : > { %2265 = vmatmul.msk.bf16.vlgmr.msra.gmra.mxu3 %vm1015_vm2, %v1115_v25 }
 0x271   : > { %v1087_v26 = vpop.xlane.xlu0 %1086 }
 0x272   : > { %v2422_v27 = vpop.eup %2421  ;;  %v1095_v28 = vmul.f32 5.656854, %v1087_v26 }
 0x273   : > { %v1110_v29 = vmul.f32 %v2422_v27, %v2813_v7 }
 0x274   : > { %2423 = vrcp.f32 %v1095_v28 }
 0x275   : > { %v1118_v59 = vpack.c.bf16 %v1110_v29, %v1110_v29  ;;  %2425 = vrcp.f32 %v2520_v53 }
 0x277   : > { %2268 = vmatmul.msk.bf16.vlgmr.msrb.gmra.mxu2 %vm1015_vm2, %v1118_v59 }
 0x27a   : > { %v2424_v30 = vpop.eup %2423 }
 0x27b   : > { %v1111_v31 = vmul.f32 %v2424_v30, %v2817_v15  ;;  %v2426_v54 = vpop.eup %2425 }
 0x27c   : > { %v1306_v56 = vmul.f32 32.0, %v2426_v54  ;;  %vm1310_vm4 = vweird.f32 %v2426_v54 }
 0x27d   : > { %v1119_v32 = vpack.c.bf16 %v1111_v31, %v1111_v31 }
 0x27e   : > { %v1307_v57 = vsub.f32 1.0, %v1306_v56 }
 0x27f   : > { %2269 = vmatmul.msk.bf16.vlgmr.msrb.gmra.mxu3 %vm1015_vm2, %v1119_v32 }
 0x280   : > { %v1308_v58 = vmul.f32 %v2426_v54, %v1307_v57 }
 0x2bc   : > { %v1136_v3 = vpop.f32.mrf.mxu0 }
 0x2bd   : > { %v1273_v33 = vadd.f32 %v1136_v3, %v2700_v10 }
 0x2bf   : > { %v1281_v34 = vsel %vm707_vm1, %v1273_v33, 0.0 }
 0x2c0   : > { %1282 = vadd.xlane.f32.xlu1 %v1281_v34 }
 0x2c4   : > { %v1138_v35 = vpop.f32.mrf.mxu0 }
 0x2cc   : > { %v1155_v36 = vpop.f32.mrf.mxu1 }
 0x2cd   : > { %v1274_v7 = vadd.f32 %v1155_v36, %v2702_v11 }
 0x2cf   : > { %v1284_v37 = vsel %vm707_vm1, %v1274_v7, 0.0 }
 0x2d0   : > { %1285 = vadd.xlane.f32.xlu2 %v1284_v37 }
 0x2d4   : > { %v1157_v16 = vpop.f32.mrf.mxu1  ;;  %v1212_v38 = vpop.f32.mrf.mxu0 }
 0x2d5   : > { %v1277_v15 = vadd.f32 %v1212_v38, %v2726_v18 }
 0x2d7   : > { %v1293_v39 = vsel %vm707_vm1, %v1277_v15, 0.0 }
 0x2d8   : > { %1294 = vadd.xlane.f32.xlu2 %v1293_v39 }
 0x2dc   : > { %v1214_v17 = vpop.f32.mrf.mxu0 }
 0x2e2   : > { %v1174_v41 = vpop.f32.mrf.mxu2 }
 0x2e3   : > { %v1275_v10 = vadd.f32 %v1174_v41, %v2704_v12 }
 0x2e4   : > { %v1231_v42 = vpop.f32.mrf.mxu1 }
 0x2e5   : > { %v1287_v43 = vsel %vm707_vm1, %v1275_v10, 0.0  ;;  %v1278_v11 = vadd.f32 %v1231_v42, %v2728_v19  ;;  %v2340_v42 = vld [vmem:[%s2649_s23 + $0x8] sm:$0xff] }
 0x2e6   : > { %1288 = vadd.xlane.f32.xlu0 %v1287_v43  ;;  %1530 = vmatpush.bf16.msrb.mxu0 %v2340_v42 }
 0x2e7   : > { %v1296_v20 = vsel %vm707_vm1, %v1278_v11, 0.0 }
 0x2ea   : > { %v1176_v44 = vpop.f32.mrf.mxu2 }
 0x2ec   : > { %v1233_v45 = vpop.f32.mrf.mxu1 }
 0x2ed   : > { %v2339_v45 = vld [vmem:[%s2649_s23] sm:$0xff] }
 0x2ee   : > { %1297 = vadd.xlane.f32.xlu0 %v1296_v20  ;;  %1531 = vmatpush.bf16.msrb.mxu0 %v2339_v45 }
 0x2f2   : > { %v1193_v23 = vpop.f32.mrf.mxu3 }
 0x2f3   : > { %v1276_v18 = vadd.f32 %v1193_v23, %v2706_v13  ;;  %v1309_v13 = vadd.f32 %v2426_v54, %v1308_v58 }
 0x2f5   : > { %v1290_v47 = vsel %vm707_vm1, %v1276_v18, 0.0  ;;  %v2858_v60 = vsel %vm1310_vm4, %v2426_v54, %v1309_v13  ;;  %v2919_v13 = vld [vmem:[%s3201_s28] ss:$0 sm:$0xff] }
 0x2f6   : > { %1291 = vadd.xlane.f32.xlu1 %v1290_v47 }
 0x2fa   : > { %v1195_v48 = vpop.f32.mrf.mxu3  ;;  %v1250_v49 = vpop.f32.mrf.mxu2 }
 0x2fb   : > { %v1279_v12 = vadd.f32 %v1250_v49, %v2738_v21 }
 0x2fd   : > { %v1299_v40 = vsel %vm707_vm1, %v1279_v12, 0.0 }
 0x2fe   : > { %1300 = vadd.xlane.f32.xlu0 %v1299_v40 }
 0x302   : > { %v1252_v51 = vpop.f32.mrf.mxu2  ;;  %v1269_v19 = vpop.f32.mrf.mxu3 }
 0x303   : > { %v1280_v0 = vadd.f32 %v1269_v19, %v2740_v22 }
 0x305   : > { %v1302_v1 = vsel %vm707_vm1, %v1280_v0, 0.0 }
 0x30a   : > { %v1271_v52 = vpop.f32.mrf.mxu3 }
 0x333   : > { %v1283_v46 = vpop.xlane.xlu1 %1282 }
 0x334   : > { %v1312_v61 = vmul.f32 %v2858_v60, %v1283_v46 }
 0x336   : > { %v2861_v21 = vsub.f32 %v1273_v33, %v1312_v61 }
 0x338   : > { %v1328_v62 = vmul.f32 %v2861_v21, %v2861_v21 }
 0x33a   : > { %v1336_v63 = vsel %vm707_vm1, %v1328_v62, 0.0 }
 0x33b   : > { %1337 = vadd.xlane.f32.xlu1 %v1336_v63 }
 0x343   : > { %1303 = vadd.xlane.f32.xlu1 %v1302_v1  ;;  %v1286_v2 = vpop.xlane.xlu2 %1285  ;;  %v2928_v1 = vld [vmem:[%s3202_s17] ss:$0 sm:$0xff] }
 0x344   : > { %v1313_v50 = vmul.f32 %v2858_v60, %v1286_v2 }
 0x346   : > { %v2869_v4 = vsub.f32 %v1274_v7, %v1313_v50 }
 0x348   : > { %v1329_v5 = vmul.f32 %v2869_v4, %v2869_v4 }
 0x34a   : > { %v1339_v6 = vsel %vm707_vm1, %v1329_v5, 0.0 }
 0x34b   : > { %1340 = vadd.xlane.f32.xlu2 %v1339_v6  ;;  %v1295_v8 = vpop.xlane.xlu2 %1294 }
 0x34c   : > { %v1316_v9 = vmul.f32 %v2858_v60, %v1295_v8 }
 0x34e   : > { %v2875_v14 = vsub.f32 %v1277_v15, %v1316_v9 }
 0x350   : > { %v1332_v22 = vmul.f32 %v2875_v14, %v2875_v14 }
 0x352   : > { %v1348_v55 = vsel %vm707_vm1, %v1332_v22, 0.0 }
 0x353   : > { %1349 = vadd.xlane.f32.xlu1 %v1348_v55 }
 0x359   : > { %v1289_v24 = vpop.xlane.xlu0 %1288 }
 0x35a   : > { %v1314_v25 = vmul.f32 %v2858_v60, %v1289_v24 }
 0x35c   : > { %v2881_v26 = vsub.f32 %v1275_v10, %v1314_v25 }
 0x35e   : > { %v1330_v27 = vmul.f32 %v2881_v26, %v2881_v26 }
 0x360   : > { %v1342_v28 = vsel %vm707_vm1, %v1330_v27, 0.0 }
 0x361   : > { %1343 = vadd.xlane.f32.xlu2 %v1342_v28  ;;  %v1298_v29 = vpop.xlane.xlu0 %1297 }
 0x362   : > { %v1317_v59 = vmul.f32 %v2858_v60, %v1298_v29 }
 0x364   : > { %v2887_v30 = vsub.f32 %v1278_v11, %v1317_v59 }
 0x366   : > { %v1333_v31 = vmul.f32 %v2887_v30, %v2887_v30 }
 0x368   : > { %v1351_v32 = vsel %vm707_vm1, %v1333_v31, 0.0 }
 0x369   : > { %1352 = vadd.xlane.f32.xlu2 %v1351_v32  ;;  %v1292_v3 = vpop.xlane.xlu1 %1291 }
 0x36a   : > { %v1315_v33 = vmul.f32 %v2858_v60, %v1292_v3 }
 0x36c   : > { %v2893_v34 = vsub.f32 %v1276_v18, %v1315_v33 }
 0x36e   : > { %v1331_v35 = vmul.f32 %v2893_v34, %v2893_v34 }
 0x370   : > { %v1345_v36 = vsel %vm707_vm1, %v1331_v35, 0.0 }
 0x371   : > { %v1301_v7 = vpop.xlane.xlu0 %1300  ;;  %1346 = vadd.xlane.f32.xlu0 %v1345_v36 }
 0x372   : > { %v1318_v37 = vmul.f32 %v2858_v60, %v1301_v7 }
 0x374   : > { %v2899_v16 = vsub.f32 %v1279_v12, %v1318_v37 }
 0x376   : > { %v1334_v38 = vmul.f32 %v2899_v16, %v2899_v16 }
 0x378   : > { %v1354_v15 = vsel %vm707_vm1, %v1334_v38, 0.0 }
 0x379   : > { %1355 = vadd.xlane.f32.xlu0 %v1354_v15 }
 0x3ae   : > { %v1338_v39 = vpop.xlane.xlu1 %1337 }
 0x3af   : > { %v1360_v17 = vmul.f32 %v1338_v39, %v2858_v60 }
 0x3b1   : > { %v1368_v41 = vadd.f32 1e-05, %v1360_v17 }
 0x3b3   : > { %2427 = vrsqrt.f32 %v1368_v41  ;;  %vm1382_vm6 = vweird.f32 %v1368_v41 }
 0x3b6   : > { %v1304_v10 = vpop.xlane.xlu1 %1303 }
 0x3b7   : > { %v1319_v43 = vmul.f32 %v2858_v60, %v1304_v10 }
 0x3b9   : > { %v2428_v11 = vpop.eup %2427  ;;  %v2907_v44 = vsub.f32 %v1280_v0, %v1319_v43 }
 0x3ba   : > { %v1377_v20 = vmul.f32 %v2428_v11, %v1368_v41  ;;  %vm1383_vm5 = vweird.f32 %v2428_v11 }
 0x3bb   : > { %v1335_v23 = vmul.f32 %v2907_v44, %v2907_v44  ;;  %vm1384_vm7 = vmor %vm1382_vm6, %vm1383_vm5 }
 0x3bc   : > { %v1378_v47 = vmul.f32 %v2428_v11, %v1377_v20 }
 0x3bd   : > { %v1357_v18 = vsel %vm707_vm1, %v1335_v23, 0.0 }
 0x3be   : > { %1358 = vadd.xlane.f32.xlu1 %v1357_v18  ;;  %v1341_v48 = vpop.xlane.xlu2 %1340  ;;  %v1379_v40 = vmul.f32 0.5, %v1378_v47 }
 0x3bf   : > { %v1361_v49 = vmul.f32 %v1341_v48, %v2858_v60 }
 0x3c0   : > { %v1380_v51 = vsub.f32 1.5, %v1379_v40 }
 0x3c1   : > { %v1369_v12 = vadd.f32 1e-05, %v1361_v49 }
 0x3c2   : > { %v1381_v52 = vmul.f32 %v2428_v11, %v1380_v51 }
 0x3c3   : > { %2429 = vrsqrt.f32 %v1369_v12  ;;  %vm1392_vm9 = vweird.f32 %v1369_v12 }
 0x3c4   : > { %v1385_v56 = vsel %vm1384_vm7, %v2428_v11, %v1381_v52 }
 0x3c5   : > { %v1456_v46 = vmul.f32 %v1385_v56, %v2861_v21 }
 0x3c6   : > { %v1350_v9 = vpop.xlane.xlu1 %1349 }
 0x3c7   : > { %v1468_v2 = vmul.f32 %v2919_v13, %v1456_v46  ;;  %v1364_v25 = vmul.f32 %v1350_v9, %v2858_v60  ;;  %v2347_v9 = vld [vmem:[%s2663_s12 + $0x30] sm:$0xff] }
 0x3c9   : > { %v2430_v19 = vpop.eup %2429  ;;  %v2934_v6 = vadd.f32 %v2928_v1, %v1468_v2  ;;  %v1372_v29 = vadd.f32 1e-05, %v1364_v25 }
 0x3ca   : > { %v1387_v53 = vmul.f32 %v2430_v19, %v1369_v12  ;;  %vm1393_vm8 = vweird.f32 %v2430_v19 }
 0x3cb   : > { %vm1394_vm10 = vmor %vm1392_vm9, %vm1393_vm8  ;;  %vm1422_vm6 = vweird.f32 %v1372_v29 }
 0x3cc   : > { %v1388_v54 = vmul.f32 %v2430_v19, %v1387_v53 }
 0x3ce   : > { %v1389_v57 = vmul.f32 0.5, %v1388_v54 }
 0x3d0   : > { %v1390_v58 = vsub.f32 1.5, %v1389_v57 }
 0x3d2   : > { %v1391_v61 = vmul.f32 %v2430_v19, %v1390_v58 }
 0x3d4   : > { %v1344_v62 = vpop.xlane.xlu2 %1343  ;;  %v1395_v63 = vsel %vm1394_vm10, %v2430_v19, %v1391_v61 }
 0x3d5   : > { %v1362_v0 = vmul.f32 %v1344_v62, %v2858_v60  ;;  %v1457_v50 = vmul.f32 %v1395_v63, %v2869_v4 }
 0x3d7   : > { %v1370_v5 = vadd.f32 1e-05, %v1362_v0  ;;  %v1469_v21 = vmul.f32 %v2919_v13, %v1457_v50 }
 0x3d9   : > { %2431 = vrsqrt.f32 %v1370_v5  ;;  %v2937_v8 = vadd.f32 %v2928_v1, %v1469_v21  ;;  %vm1402_vm12 = vweird.f32 %v1370_v5 }
 0x3db   : > { %v1488_v55 = vpack.c.bf16 %v2937_v8, %v2934_v6 }
 0x3dc   : > { %v1353_v22 = vpop.xlane.xlu2 %1352 }
 0x3dd   : > { %v1365_v24 = vmul.f32 %v1353_v22, %v2858_v60  ;;  %2278 = vmatmul.msk.bf16.vlgmr.msrb.gmra.mxu0 %vm707_vm1, %v1488_v55  ;;  %v2346_v55 = vld [vmem:[%s2663_s12 + $0x28] sm:$0xff] }
 0x3df   : > { %v2432_v4 = vpop.eup %2431  ;;  %v1373_v28 = vadd.f32 1e-05, %v1365_v24 }
 0x3e0   : > { %v1397_v27 = vmul.f32 %v2432_v4, %v1370_v5  ;;  %vm1403_vm11 = vweird.f32 %v2432_v4  ;;  %v2348_v5 = vld [vmem:[%s2663_s12 + $0x38] sm:$0xff] }
 0x3e1   : > { %2433 = vrsqrt.f32 %v1373_v28  ;;  %vm1404_vm13 = vmor %vm1402_vm12, %vm1403_vm11  ;;  %vm1432_vm4 = vweird.f32 %v1373_v28  ;;  %1633 = vmatpush.bf16.msra.mxu1 %v2348_v5 }
 0x3e2   : > { %v1398_v59 = vmul.f32 %v2432_v4, %v1397_v27  ;;  %2435 = vrsqrt.f32 %v1372_v29  ;;  %v2345_v27 = vld [vmem:[%s2663_s12 + $0x20] sm:$0xff] }
 0x3e4   : > { %v1347_v31 = vpop.xlane.xlu0 %1346  ;;  %v1399_v33 = vmul.f32 0.5, %v1398_v59 }
 0x3e5   : > { %v1363_v32 = vmul.f32 %v1347_v31, %v2858_v60  ;;  %1634 = vmatpush.bf16.msra.mxu1 %v2347_v9  ;;  %v2344_v31 = vld [vmem:[%s2663_s12 + $0x18] sm:$0xff] }
 0x3e6   : > { %v1400_v36 = vsub.f32 1.5, %v1399_v33 }
 0x3e7   : > { %v1371_v3 = vadd.f32 1e-05, %v1363_v32  ;;  %v2434_v35 = vpop.eup %2433 }
 0x3e8   : > { %v2436_v7 = vpop.eup %2435  ;;  %v1427_v37 = vmul.f32 %v2434_v35, %v1373_v28  ;;  %v1401_v39 = vmul.f32 %v2432_v4, %v1400_v36  ;;  %vm1433_vm2 = vweird.f32 %v2434_v35 }
 0x3e9   : > { %2437 = vrsqrt.f32 %v1371_v3  ;;  %v1417_v15 = vmul.f32 %v2436_v7, %v1372_v29  ;;  %vm1412_vm15 = vweird.f32 %v1371_v3  ;;  %vm1423_vm3 = vweird.f32 %v2436_v7  ;;  %vm1434_vm5 = vmor %vm1432_vm4, %vm1433_vm2  ;;  %1635 = vmatpush.bf16.msra.mxu1 %v2346_v55  ;;  %v2390_v55 = vld [vmem:[%s650_s16] ss:$0 sm:$0xff] }
 0x3ea   : > { %v1428_v41 = vmul.f32 %v2434_v35, %v1427_v37  ;;  %v1405_v43 = vsel %vm1404_vm13, %v2432_v4, %v1401_v39  ;;  %vm1424_vm7 = vmor %vm1422_vm6, %vm1423_vm3 }
 0x3eb   : > { %v1418_v42 = vmul.f32 %v2436_v7, %v1417_v15  ;;  %v1458_v23 = vmul.f32 %v1405_v43, %v2881_v26 }
 0x3ec   : > { %v1429_v45 = vmul.f32 0.5, %v1428_v41  ;;  %v2341_v41 = vld [vmem:[%s2663_s12] sm:$0xff] }
 0x3ed   : > { %v1419_v18 = vmul.f32 0.5, %v1418_v42  ;;  %v1470_v40 = vmul.f32 %v2919_v13, %v1458_v23  ;;  %1636 = vmatpush.bf16.msra.mxu1 %v2345_v27 }
 0x3ee   : > { %v1430_v48 = vsub.f32 1.5, %v1429_v45 }
 0x3ef   : > { %v2438_v38 = vpop.eup %2437  ;;  %v1420_v51 = vsub.f32 1.5, %v1419_v18  ;;  %v2950_v53 = vadd.f32 %v2928_v1, %v1470_v40 }
 0x3f0   : > { %v1407_v17 = vmul.f32 %v2438_v38, %v1371_v3  ;;  %vm1413_vm14 = vweird.f32 %v2438_v38  ;;  %v1431_v52 = vmul.f32 %v2434_v35, %v1430_v48 }
 0x3f1   : > { %vm1414_vm0 = vmor %vm1412_vm15, %vm1413_vm14  ;;  %v1421_v54 = vmul.f32 %v2436_v7, %v1420_v51  ;;  %1637 = vmatpush.bf16.msra.mxu1 %v2344_v31 }
 0x3f2   : > { %v1408_v10 = vmul.f32 %v2438_v38, %v1407_v17  ;;  %v1435_v56 = vsel %vm1434_vm5, %v2434_v35, %v1431_v52  ;;  %v2343_v35 = vld [vmem:[%s2663_s12 + $0x10] sm:$0xff] }
 0x3f3   : > { %v1425_v57 = vsel %vm1424_vm7, %v2436_v7, %v1421_v54  ;;  %v1461_v58 = vmul.f32 %v1435_v56, %v2887_v30  ;;  %v1356_v30 = vpop.xlane.xlu0 %1355 }
 0x3f4   : > { %v1409_v11 = vmul.f32 0.5, %v1408_v10  ;;  %v1460_v46 = vmul.f32 %v1425_v57, %v2875_v14  ;;  %v1366_v14 = vmul.f32 %v1356_v30, %v2858_v60 }
 0x3f5   : > { %v1473_v61 = vmul.f32 %v2919_v13, %v1461_v58  ;;  %1638 = vmatpush.bf16.msra.mxu1 %v2343_v35 }
 0x3f6   : > { %v1410_v20 = vsub.f32 1.5, %v1409_v11  ;;  %v1472_v62 = vmul.f32 %v2919_v13, %v1460_v46  ;;  %v1374_v50 = vadd.f32 1e-05, %v1366_v14 }
 0x3f7   : > { %v2963_v63 = vadd.f32 %v2928_v1, %v1473_v61 }
 0x3f8   : > { %v1411_v47 = vmul.f32 %v2438_v38, %v1410_v20  ;;  %v2966_v0 = vadd.f32 %v2928_v1, %v1472_v62  ;;  %2439 = vrsqrt.f32 %v1374_v50  ;;  %vm1442_vm9 = vweird.f32 %v1374_v50 }
 0x3fa   : > { %v1415_v49 = vsel %vm1414_vm0, %v2438_v38, %v1411_v47  ;;  %v1490_v2 = vpack.c.bf16 %v2963_v63, %v2966_v0  ;;  %v2342_v38 = vld [vmem:[%s2663_s12 + $0x8] sm:$0xff] }
 0x3fb   : > { %v1459_v12 = vmul.f32 %v1415_v49, %v2893_v34  ;;  %1639 = vmatpush.bf16.msra.mxu1 %v2342_v38 }
 0x3fd   : > { %v1471_v19 = vmul.f32 %v2919_v13, %v1459_v12 }
 0x3fe   : > { %v2440_v21 = vpop.eup %2439 }
 0x3ff   : > { %v2953_v26 = vadd.f32 %v2928_v1, %v1471_v19  ;;  %v1437_v22 = vmul.f32 %v2440_v21, %v1374_v50  ;;  %vm1443_vm8 = vweird.f32 %v2440_v21  ;;  %1640 = vmatpush.bf16.msra.mxu1 %v2341_v41 }
 0x400   : > { %vm1444_vm10 = vmor %vm1442_vm9, %vm1443_vm8 }
 0x401   : > { %v1489_v34 = vpack.c.bf16 %v2953_v26, %v2950_v53  ;;  %v1438_v24 = vmul.f32 %v2440_v21, %v1437_v22 }
 0x403   : > { %2279 = vmatmul.msk.bf16.gmra.mxu0 %vm707_vm1, %v1489_v34  ;;  %v1439_v29 = vmul.f32 0.5, %v1438_v24 }
 0x405   : > { %v1440_v59 = vsub.f32 1.5, %v1439_v29 }
 0x407   : > { %v1441_v3 = vmul.f32 %v2440_v21, %v1440_v59 }
 0x409   : > { %v1445_v7 = vsel %vm1444_vm10, %v2440_v21, %v1441_v3 }
 0x40a   : > { %v1462_v39 = vmul.f32 %v1445_v7, %v2899_v16 }
 0x40c   : > { %v1474_v43 = vmul.f32 %v2919_v13, %v1462_v39 }
 0x40e   : > { %v2986_v45 = vadd.f32 %v2928_v1, %v1474_v43 }
 0x413   : > { %2280 = vmatmul.msk.bf16.gmra.mxu0 %vm707_vm1, %v1490_v2 }
 0x431   : > { %v1359_v4 = vpop.xlane.xlu1 %1358 }
 0x432   : > { %v1367_v25 = vmul.f32 %v1359_v4, %v2858_v60 }
 0x434   : > { %v1375_v28 = vadd.f32 1e-05, %v1367_v25 }
 0x436   : > { %2441 = vrsqrt.f32 %v1375_v28  ;;  %vm1452_vm12 = vweird.f32 %v1375_v28 }
 0x43c   : > { %v2442_v32 = vpop.eup %2441 }
 0x43d   : > { %v1447_v33 = vmul.f32 %v2442_v32, %v1375_v28  ;;  %vm1453_vm11 = vweird.f32 %v2442_v32 }
 0x43e   : > { %vm1454_vm13 = vmor %vm1452_vm12, %vm1453_vm11 }
 0x43f   : > { %v1448_v36 = vmul.f32 %v2442_v32, %v1447_v33 }
 0x441   : > { %v1449_v37 = vmul.f32 0.5, %v1448_v36 }
 0x443   : > { %v1450_v15 = vsub.f32 1.5, %v1449_v37 }
 0x445   : > { %v1451_v17 = vmul.f32 %v2442_v32, %v1450_v15 }
 0x447   : > { %v1455_v10 = vsel %vm1454_vm13, %v2442_v32, %v1451_v17 }
 0x448   : > { %v1463_v42 = vmul.f32 %v1455_v10, %v2907_v44  ;;  %v2389_v44 = vld [vmem:[%s642_s26] ss:$0 sm:$0xff] }
 0x44a   : > { %v1475_v11 = vmul.f32 %v2919_v13, %v1463_v42 }
 0x44c   : > { %v2989_v20 = vadd.f32 %v2928_v1, %v1475_v11 }
 0x44e   : > { %v1491_v16 = vpack.c.bf16 %v2989_v20, %v2986_v45 }
 0x450   : > { %2281 = vmatmul.msk.bf16.gmra.mxu0 %vm707_vm1, %v1491_v16 }
 0x45a   : > { %v1533_v23 = vpop.f32.mrf.mxu0 }
 0x45b   : > { %v1534_v18 = vadd.f32 %v2389_v44, %v1533_v23 }
 0x45d   : > { %v1553_v48 = vmax.f32 %v1534_v18, 0.0 }
 0x462   : > { %v1535_v47 = vpop.f32.mrf.mxu0 }
 0x463   : > { %v1536_v13 = vadd.f32 %v2389_v44, %v1535_v47 }
 0x465   : > { %v1554_v49 = vmax.f32 %v1536_v13, 0.0 }
 0x467   : > { %v1561_v12 = vpack.c.bf16 %v1554_v49, %v1553_v48 }
 0x469   : > { %1641 = vmatmul.bf16.vlgmr.msra.gmra.mxu1 %v1561_v12 }
 0x480   : > { %v1538_v1 = vpop.f32.mrf.mxu0 }
 0x481   : > { %v1539_v40 = vadd.f32 %v2389_v44, %v1538_v1 }
 0x483   : > { %v1555_v52 = vmax.f32 %v1539_v40, 0.0 }
 0x488   : > { %v1540_v51 = vpop.f32.mrf.mxu0 }
 0x489   : > { %v1541_v19 = vadd.f32 %v2389_v44, %v1540_v51 }
 0x48b   : > { %v1556_v54 = vmax.f32 %v1541_v19, 0.0 }
 0x48d   : > { %v1562_v34 = vpack.c.bf16 %v1556_v54, %v1555_v52 }
 0x48f   : > { %1646 = vmatmul.bf16.gmra.mxu1 %v1562_v34 }
 0x490   : > { %v1543_v56 = vpop.f32.mrf.mxu0 }
 0x491   : > { %v1544_v57 = vadd.f32 %v2389_v44, %v1543_v56 }
 0x493   : > { %v1557_v61 = vmax.f32 %v1544_v57, 0.0 }
 0x498   : > { %v1545_v58 = vpop.f32.mrf.mxu0 }
 0x499   : > { %v1546_v46 = vadd.f32 %v2389_v44, %v1545_v58 }
 0x49b   : > { %v1558_v62 = vmax.f32 %v1546_v46, 0.0 }
 0x49d   : > { %v1563_v2 = vpack.c.bf16 %v1558_v62, %v1557_v61 }
 0x49f   : > { %1651 = vmatmul.bf16.gmra.mxu1 %v1563_v2 }
 0x4cd   : > { %v1548_v30 = vpop.f32.mrf.mxu0 }
 0x4ce   : > { %v1549_v14 = vadd.f32 %v2389_v44, %v1548_v30 }
 0x4d0   : > { %v1559_v21 = vmax.f32 %v1549_v14, 0.0 }
 0x4d5   : > { %v1550_v50 = vpop.f32.mrf.mxu0 }
 0x4d6   : > { %v1551_v5 = vadd.f32 %v2389_v44, %v1550_v50 }
 0x4d8   : > { %v1560_v9 = vmax.f32 %v1551_v5, 0.0 }
 0x4da   : > { %v1564_v22 = vpack.c.bf16 %v1560_v9, %v1559_v21 }
 0x4dc   : > { %1656 = vmatmul.bf16.gmra.mxu1 %v1564_v22 }
 0x4e6   : > { %v1642_v24 = vpop.f32.mrf.mxu1 }
 0x4e7   : > { %v1643_v4 = vadd.f32 %v2390_v55, %v1642_v24 }
 0x4e9   : > { %v1662_v25 = vadd.f32 %v1643_v4, %v2934_v6 }
 0x4eb   : > { %v1670_v27 = vsel %vm707_vm1, %v1662_v25, 0.0 }
 0x4ec   : > { %1671 = vadd.xlane.f32.xlu2 %v1670_v27 }
 0x4ee   : > { %v1644_v28 = vpop.f32.mrf.mxu1 }
 0x4ef   : > { %v1645_v29 = vadd.f32 %v2390_v55, %v1644_v28 }
 0x4f1   : > { %v1663_v59 = vadd.f32 %v1645_v29, %v2937_v8 }
 0x4f3   : > { %v1673_v31 = vsel %vm707_vm1, %v1663_v59, 0.0 }
 0x4f4   : > { %1674 = vadd.xlane.f32.xlu0 %v1673_v31 }
 0x50c   : > { %v1647_v32 = vpop.f32.mrf.mxu1 }
 0x50d   : > { %v1648_v3 = vadd.f32 %v2390_v55, %v1647_v32 }
 0x50f   : > { %v1664_v33 = vadd.f32 %v1648_v3, %v2950_v53 }
 0x511   : > { %v1676_v35 = vsel %vm707_vm1, %v1664_v33, 0.0 }
 0x512   : > { %1677 = vadd.xlane.f32.xlu1 %v1676_v35 }
 0x514   : > { %v1649_v36 = vpop.f32.mrf.mxu1 }
 0x515   : > { %v1650_v7 = vadd.f32 %v2390_v55, %v1649_v36 }
 0x517   : > { %v1665_v6 = vadd.f32 %v1650_v7, %v2953_v26 }
 0x519   : > { %v1679_v37 = vsel %vm707_vm1, %v1665_v6, 0.0 }
 0x51a   : > { %1680 = vadd.xlane.f32.xlu2 %v1679_v37 }
 0x51c   : > { %v1652_v38 = vpop.f32.mrf.mxu1 }
 0x51d   : > { %v1653_v15 = vadd.f32 %v2390_v55, %v1652_v38 }
 0x51f   : > { %v1666_v8 = vadd.f32 %v1653_v15, %v2966_v0 }
 0x521   : > { %v1682_v39 = vsel %vm707_vm1, %v1666_v8, 0.0 }
 0x522   : > { %1683 = vadd.xlane.f32.xlu0 %v1682_v39 }
 0x524   : > { %v1654_v17 = vpop.f32.mrf.mxu1 }
 0x525   : > { %v1655_v41 = vadd.f32 %v2390_v55, %v1654_v17 }
 0x527   : > { %v1667_v53 = vadd.f32 %v1655_v41, %v2963_v63 }
 0x529   : > { %v1685_v10 = vsel %vm707_vm1, %v1667_v53, 0.0 }
 0x52a   : > { %1686 = vadd.xlane.f32.xlu1 %v1685_v10  ;;  %v3075_v10 = vld [vmem:[%s653_s22] ss:$0 sm:$0xff]  ;;  %s3203_s22 = sld [smem:[#allocation12_spill]] (!%p2314_p6) }
 0x559   : > { %v1657_v42 = vpop.f32.mrf.mxu1 }
 0x55a   : > { %v1658_v43 = vadd.f32 %v2390_v55, %v1657_v42 }
 0x55c   : > { %v1668_v26 = vadd.f32 %v1658_v43, %v2986_v45 }
 0x55e   : > { %v1688_v11 = vsel %vm707_vm1, %v1668_v26, 0.0 }
 0x55f   : > { %1689 = vadd.xlane.f32.xlu2 %v1688_v11  ;;  %v1672_v16 = vpop.xlane.xlu2 %1671 }
 0x560   : > { %v1694_v0 = vmul.f32 %v1672_v16, %v2858_v60 }
 0x561   : > { %v1659_v23 = vpop.f32.mrf.mxu1 }
 0x562   : > { %v1660_v44 = vadd.f32 %v2390_v55, %v1659_v23  ;;  %v3019_v18 = vsub.f32 %v1662_v25, %v1694_v0 }
 0x564   : > { %v1669_v47 = vadd.f32 %v1660_v44, %v2989_v20  ;;  %v1710_v63 = vmul.f32 %v3019_v18, %v3019_v18 }
 0x566   : > { %v1691_v13 = vsel %vm707_vm1, %v1669_v47, 0.0  ;;  %v1718_v48 = vsel %vm707_vm1, %v1710_v63, 0.0 }
 0x567   : > { %1692 = vadd.xlane.f32.xlu0 %v1691_v13  ;;  %v1675_v45 = vpop.xlane.xlu0 %1674  ;;  %1719 = vadd.xlane.f32.xlu1 %v1718_v48 }
 0x568   : > { %v1695_v49 = vmul.f32 %v1675_v45, %v2858_v60 }
 0x56a   : > { %v3027_v12 = vsub.f32 %v1663_v59, %v1695_v49 }
 0x56c   : > { %v1711_v1 = vmul.f32 %v3027_v12, %v3027_v12 }
 0x56e   : > { %v1721_v40 = vsel %vm707_vm1, %v1711_v1, 0.0 }
 0x56f   : > { %1722 = vadd.xlane.f32.xlu2 %v1721_v40 }
 0x585   : > { %v1678_v20 = vpop.xlane.xlu1 %1677 }
 0x586   : > { %v1696_v51 = vmul.f32 %v1678_v20, %v2858_v60 }
 0x588   : > { %v3033_v19 = vsub.f32 %v1664_v33, %v1696_v51 }
 0x58a   : > { %v1712_v52 = vmul.f32 %v3033_v19, %v3033_v19 }
 0x58c   : > { %v1724_v54 = vsel %vm707_vm1, %v1712_v52, 0.0 }
 0x58d   : > { %v1681_v34 = vpop.xlane.xlu2 %1680  ;;  %1725 = vadd.xlane.f32.xlu0 %v1724_v54 }
 0x58e   : > { %v1697_v56 = vmul.f32 %v1681_v34, %v2858_v60 }
 0x590   : > { %v3039_v57 = vsub.f32 %v1665_v6, %v1697_v56 }
 0x592   : > { %v1713_v58 = vmul.f32 %v3039_v57, %v3039_v57 }
 0x594   : > { %v1727_v46 = vsel %vm707_vm1, %v1713_v58, 0.0 }
 0x595   : > { %1728 = vadd.xlane.f32.xlu1 %v1727_v46  ;;  %v1684_v61 = vpop.xlane.xlu0 %1683 }
 0x596   : > { %v1698_v62 = vmul.f32 %v1684_v61, %v2858_v60 }
 0x598   : > { %v3045_v2 = vsub.f32 %v1666_v8, %v1698_v62 }
 0x59a   : > { %v1714_v30 = vmul.f32 %v3045_v2, %v3045_v2 }
 0x59c   : > { %v1730_v14 = vsel %vm707_vm1, %v1714_v30, 0.0 }
 0x59d   : > { %1731 = vadd.xlane.f32.xlu2 %v1730_v14  ;;  %v1687_v50 = vpop.xlane.xlu1 %1686 }
 0x59e   : > { %v1699_v5 = vmul.f32 %v1687_v50, %v2858_v60 }
 0x5a0   : > { %v3051_v21 = vsub.f32 %v1667_v53, %v1699_v5 }
 0x5a2   : > { %v1715_v9 = vmul.f32 %v3051_v21, %v3051_v21 }
 0x5a4   : > { %v1733_v22 = vsel %vm707_vm1, %v1715_v9, 0.0 }
 0x5a5   : > { %1734 = vadd.xlane.f32.xlu0 %v1733_v22 }
 0x5d2   : > { %v1690_v55 = vpop.xlane.xlu2 %1689 }
 0x5d3   : > { %v1700_v24 = vmul.f32 %v1690_v55, %v2858_v60 }
 0x5d5   : > { %v3057_v4 = vsub.f32 %v1668_v26, %v1700_v24  ;;  %v3082_v26 = vld [vmem:[%s656_s20] ss:$0 sm:$0xff] }
 0x5d7   : > { %v1716_v25 = vmul.f32 %v3057_v4, %v3057_v4 }
 0x5d9   : > { %v1736_v27 = vsel %vm707_vm1, %v1716_v25, 0.0 }
 0x5da   : > { %v1693_v28 = vpop.xlane.xlu0 %1692  ;;  %1737 = vadd.xlane.f32.xlu1 %v1736_v27  ;;  %v1720_v59 = vpop.xlane.xlu1 %1719 }
 0x5db   : > { %v1701_v29 = vmul.f32 %v1693_v28, %v2858_v60  ;;  %v1742_v31 = vmul.f32 %v1720_v59, %v2858_v60 }
 0x5dd   : > { %v3064_v32 = vsub.f32 %v1669_v47, %v1701_v29  ;;  %v1750_v3 = vadd.f32 1e-05, %v1742_v31 }
 0x5df   : > { %v1717_v33 = vmul.f32 %v3064_v32, %v3064_v32  ;;  %2443 = vrsqrt.f32 %v1750_v3  ;;  %vm1764_vm15 = vweird.f32 %v1750_v3 }
 0x5e1   : > { %v1739_v35 = vsel %vm707_vm1, %v1717_v33, 0.0 }
 0x5e2   : > { %1740 = vadd.xlane.f32.xlu2 %v1739_v35  ;;  %v1723_v36 = vpop.xlane.xlu2 %1722 }
 0x5e3   : > { %v1743_v7 = vmul.f32 %v1723_v36, %v2858_v60 }
 0x5e5   : > { %v2444_v6 = vpop.eup %2443  ;;  %v1751_v37 = vadd.f32 1e-05, %v1743_v7 }
 0x5e6   : > { %v1759_v38 = vmul.f32 %v2444_v6, %v1750_v3  ;;  %vm1765_vm14 = vweird.f32 %v2444_v6 }
 0x5e7   : > { %2445 = vrsqrt.f32 %v1751_v37  ;;  %vm1766_vm0 = vmor %vm1764_vm15, %vm1765_vm14  ;;  %vm1774_vm3 = vweird.f32 %v1751_v37 }
 0x5e8   : > { %v1760_v15 = vmul.f32 %v2444_v6, %v1759_v38 }
 0x5ea   : > { %v1761_v8 = vmul.f32 0.5, %v1760_v15 }
 0x5ec   : > { %v1762_v39 = vsub.f32 1.5, %v1761_v8 }
 0x5ed   : > { %v2446_v17 = vpop.eup %2445 }
 0x5ee   : > { %v1763_v41 = vmul.f32 %v2444_v6, %v1762_v39  ;;  %v1769_v53 = vmul.f32 %v2446_v17, %v1751_v37  ;;  %vm1775_vm2 = vweird.f32 %v2446_v17 }
 0x5ef   : > { %vm1776_vm4 = vmor %vm1774_vm3, %vm1775_vm2 }
 0x5f0   : > { %v1767_v42 = vsel %vm1766_vm0, %v2444_v6, %v1763_v41  ;;  %v1770_v43 = vmul.f32 %v2446_v17, %v1769_v53 }
 0x5f1   : > { %v1838_v11 = vmul.f32 %v1767_v42, %v3019_v18 }
 0x5f2   : > { %v1771_v16 = vmul.f32 0.5, %v1770_v43 }
 0x5f3   : > { %v1850_v0 = vmul.f32 %v3075_v10, %v1838_v11 }
 0x5f4   : > { %v1772_v23 = vsub.f32 1.5, %v1771_v16 }
 0x5f5   : > { %v3087_v44 = vadd.f32 %v3082_v26, %v1850_v0 }
 0x5f6   : > { %v1773_v47 = vmul.f32 %v2446_v17, %v1772_v23 }
 0x5f7   : > { %1870 = vst.msk [vmem:[#allocation2] sm:$0xff] %vm707_vm1, %v3087_v44 }
 0x5f8   : > { %v1777_v63 = vsel %vm1776_vm4, %v2446_v17, %v1773_v47 }
 0x5f9   : > { %v1839_v13 = vmul.f32 %v1777_v63, %v3027_v12 }
 0x5fb   : > { %v1851_v48 = vmul.f32 %v3075_v10, %v1839_v13 }
 0x5fd   : > { %v3094_v18 = vadd.f32 %v3082_v26, %v1851_v48 }
 0x5ff   : > { %1871 = vst.msk [vmem:[#allocation2 + $0x8] sm:$0xff] %vm707_vm1, %v3094_v18 }
 0x600   : > { %v1726_v45 = vpop.xlane.xlu0 %1725 }
 0x601   : > { %v1744_v49 = vmul.f32 %v1726_v45, %v2858_v60 }
 0x603   : > { %v1752_v1 = vadd.f32 1e-05, %v1744_v49 }
 0x605   : > { %2447 = vrsqrt.f32 %v1752_v1  ;;  %vm1784_vm6 = vweird.f32 %v1752_v1 }
 0x608   : > { %v1729_v40 = vpop.xlane.xlu1 %1728 }
 0x609   : > { %v1745_v20 = vmul.f32 %v1729_v40, %v2858_v60 }
 0x60b   : > { %v2448_v51 = vpop.eup %2447  ;;  %v1753_v52 = vadd.f32 1e-05, %v1745_v20 }
 0x60c   : > { %v1779_v54 = vmul.f32 %v2448_v51, %v1752_v1  ;;  %vm1785_vm5 = vweird.f32 %v2448_v51 }
 0x60d   : > { %2449 = vrsqrt.f32 %v1753_v52  ;;  %vm1786_vm7 = vmor %vm1784_vm6, %vm1785_vm5  ;;  %vm1794_vm9 = vweird.f32 %v1753_v52 }
 0x60e   : > { %v1780_v12 = vmul.f32 %v2448_v51, %v1779_v54 }
 0x610   : > { %v1781_v34 = vmul.f32 0.5, %v1780_v12  ;;  %v1732_v56 = vpop.xlane.xlu2 %1731 }
 0x611   : > { %v1746_v58 = vmul.f32 %v1732_v56, %v2858_v60 }
 0x612   : > { %v1782_v46 = vsub.f32 1.5, %v1781_v34 }
 0x613   : > { %v2450_v61 = vpop.eup %2449  ;;  %v1754_v62 = vadd.f32 1e-05, %v1746_v58 }
 0x614   : > { %v1783_v30 = vmul.f32 %v2448_v51, %v1782_v46  ;;  %v1789_v14 = vmul.f32 %v2450_v61, %v1753_v52  ;;  %vm1795_vm8 = vweird.f32 %v2450_v61 }
 0x615   : > { %2451 = vrsqrt.f32 %v1754_v62  ;;  %vm1796_vm10 = vmor %vm1794_vm9, %vm1795_vm8  ;;  %vm1804_vm12 = vweird.f32 %v1754_v62 }
 0x616   : > { %v1787_v50 = vsel %vm1786_vm7, %v2448_v51, %v1783_v30  ;;  %v1790_v5 = vmul.f32 %v2450_v61, %v1789_v14 }
 0x617   : > { %v1840_v9 = vmul.f32 %v1787_v50, %v3033_v19 }
 0x618   : > { %v1791_v22 = vmul.f32 0.5, %v1790_v5  ;;  %v1735_v55 = vpop.xlane.xlu0 %1734 }
 0x619   : > { %v1852_v24 = vmul.f32 %v3075_v10, %v1840_v9  ;;  %v1747_v25 = vmul.f32 %v1735_v55, %v2858_v60 }
 0x61a   : > { %v1792_v27 = vsub.f32 1.5, %v1791_v22 }
 0x61b   : > { %v2452_v28 = vpop.eup %2451  ;;  %v3105_v29 = vadd.f32 %v3082_v26, %v1852_v24  ;;  %v1755_v59 = vadd.f32 1e-05, %v1747_v25 }
 0x61c   : > { %v1793_v31 = vmul.f32 %v2450_v61, %v1792_v27  ;;  %v1799_v3 = vmul.f32 %v2452_v28, %v1754_v62  ;;  %vm1805_vm11 = vweird.f32 %v2452_v28 }
 0x61d   : > { %1872 = vst.msk [vmem:[#allocation2 + $0x10] sm:$0xff] %vm707_vm1, %v3105_v29  ;;  %2453 = vrsqrt.f32 %v1755_v59  ;;  %vm1806_vm13 = vmor %vm1804_vm12, %vm1805_vm11  ;;  %vm1814_vm15 = vweird.f32 %v1755_v59 }
 0x61e   : > { %v1797_v19 = vsel %vm1796_vm10, %v2450_v61, %v1793_v31  ;;  %v1800_v33 = vmul.f32 %v2452_v28, %v1799_v3 }
 0x61f   : > { %v1841_v35 = vmul.f32 %v1797_v19, %v3039_v57 }
 0x620   : > { %v1801_v36 = vmul.f32 0.5, %v1800_v33 }
 0x621   : > { %v1853_v7 = vmul.f32 %v3075_v10, %v1841_v35 }
 0x622   : > { %v1802_v6 = vsub.f32 1.5, %v1801_v36 }
 0x623   : > { %v2454_v37 = vpop.eup %2453  ;;  %v3112_v38 = vadd.f32 %v3082_v26, %v1853_v7 }
 0x624   : > { %v1803_v15 = vmul.f32 %v2452_v28, %v1802_v6  ;;  %v1809_v8 = vmul.f32 %v2454_v37, %v1755_v59  ;;  %vm1815_vm14 = vweird.f32 %v2454_v37 }
 0x625   : > { %1873 = vst.msk [vmem:[#allocation2 + $0x18] sm:$0xff] %vm707_vm1, %v3112_v38  ;;  %vm1816_vm0 = vmor %vm1814_vm15, %vm1815_vm14 }
 0x626   : > { %v1807_v39 = vsel %vm1806_vm13, %v2452_v28, %v1803_v15  ;;  %v1810_v17 = vmul.f32 %v2454_v37, %v1809_v8 }
 0x627   : > { %v1842_v57 = vmul.f32 %v1807_v39, %v3045_v2 }
 0x628   : > { %v1811_v41 = vmul.f32 0.5, %v1810_v17 }
 0x629   : > { %v1854_v53 = vmul.f32 %v3075_v10, %v1842_v57 }
 0x62a   : > { %v1812_v42 = vsub.f32 1.5, %v1811_v41 }
 0x62b   : > { %v1866_v43 = vadd.f32 %v3082_v26, %v1854_v53 }
 0x62c   : > { %v1813_v11 = vmul.f32 %v2454_v37, %v1812_v42 }
 0x62d   : > { %1874 = vst.msk [vmem:[#allocation2 + $0x20] sm:$0xff] %vm707_vm1, %v1866_v43 }
 0x62e   : > { %v1817_v16 = vsel %vm1816_vm0, %v2454_v37, %v1813_v11 }
 0x62f   : > { %v1843_v0 = vmul.f32 %v1817_v16, %v3051_v21 }
 0x631   : > { %v1855_v23 = vmul.f32 %v3075_v10, %v1843_v0 }
 0x633   : > { %v1867_v47 = vadd.f32 %v3082_v26, %v1855_v23 }
 0x635   : > { %1875 = vst.msk [vmem:[#allocation2 + $0x28] sm:$0xff] %vm707_vm1, %v1867_v47 }
 0x64d   : > { %v1738_v2 = vpop.xlane.xlu1 %1737 }
 0x64e   : > { %v1748_v63 = vmul.f32 %v1738_v2, %v2858_v60 }
 0x650   : > { %v1756_v13 = vadd.f32 1e-05, %v1748_v63 }
 0x652   : > { %2455 = vrsqrt.f32 %v1756_v13  ;;  %vm1824_vm3 = vweird.f32 %v1756_v13 }
 0x655   : > { %v1741_v48 = vpop.xlane.xlu2 %1740 }
 0x656   : > { %v1749_v45 = vmul.f32 %v1741_v48, %v2858_v60 }
 0x658   : > { %v2456_v49 = vpop.eup %2455  ;;  %v1757_v1 = vadd.f32 1e-05, %v1749_v45 }
 0x659   : > { %v1819_v40 = vmul.f32 %v2456_v49, %v1756_v13  ;;  %vm1825_vm2 = vweird.f32 %v2456_v49 }
 0x65a   : > { %2457 = vrsqrt.f32 %v1757_v1  ;;  %vm1826_vm4 = vmor %vm1824_vm3, %vm1825_vm2  ;;  %vm1834_vm6 = vweird.f32 %v1757_v1 }
 0x65b   : > { %v1820_v20 = vmul.f32 %v2456_v49, %v1819_v40 }
 0x65d   : > { %v1821_v21 = vmul.f32 0.5, %v1820_v20 }
 0x65f   : > { %v1822_v51 = vsub.f32 1.5, %v1821_v21 }
 0x660   : > { %v2458_v52 = vpop.eup %2457 }
 0x661   : > { %v1823_v54 = vmul.f32 %v2456_v49, %v1822_v51  ;;  %v1829_v12 = vmul.f32 %v2458_v52, %v1757_v1  ;;  %vm1835_vm5 = vweird.f32 %v2458_v52 }
 0x662   : > { %vm1836_vm7 = vmor %vm1834_vm6, %vm1835_vm5 }
 0x663   : > { %v1827_v34 = vsel %vm1826_vm4, %v2456_v49, %v1823_v54  ;;  %v1830_v56 = vmul.f32 %v2458_v52, %v1829_v12 }
 0x664   : > { %v1844_v58 = vmul.f32 %v1827_v34, %v3057_v4 }
 0x665   : > { %v1831_v46 = vmul.f32 0.5, %v1830_v56 }
 0x666   : > { %v1856_v60 = vmul.f32 %v3075_v10, %v1844_v58 }
 0x667   : > { %v1832_v61 = vsub.f32 1.5, %v1831_v46 }
 0x668   : > { %v1868_v62 = vadd.f32 %v3082_v26, %v1856_v60 }
 0x669   : > { %v1833_v30 = vmul.f32 %v2458_v52, %v1832_v61 }
 0x66a   : > { %1876 = vst.msk [vmem:[#allocation2 + $0x30] sm:$0xff] %vm707_vm1, %v1868_v62 }
 0x66b   : > { %v1837_v14 = vsel %vm1836_vm7, %v2458_v52, %v1833_v30 }
 0x66c   : > { %v1845_v50 = vmul.f32 %v1837_v14, %v3064_v32 }
 0x66e   : > { %v1857_v5 = vmul.f32 %v3075_v10, %v1845_v50  ;;  %1881 = sbr.rel (%p2314_p6) target bundleno = 2061 (0x80d), region = 84 }
 0x670   : > { %v1869_v9 = vadd.f32 %v3082_v26, %v1857_v5 }
 0x672   : > { %1877 = vst.msk [vmem:[#allocation2 + $0x38] sm:$0xff] %vm707_vm1, %v1869_v9 }
 0x673   : > { %v2350_v4 = vld [vmem:[%s3203_s22 + $0x8] sm:$0xff]  ;;  %v1882_v22 = vsel %vm707_vm1, %v3087_v44, -inf  ;;  %v1889_v55 = vsel %vm707_vm1, %v3094_v18, -inf  ;;  %v1896_v32 = vsel %vm707_vm1, %v3105_v29, -inf  ;;  %v1903_v10 = vsel %vm707_vm1, %v3112_v38, -inf  ;;  %v2349_v28 = vld [vmem:[%s3203_s22] sm:$0xff] }
 0x674   : > { %v1883_v26 = vrot.slane %v1882_v22, 4  ;;  %v1890_v24 = vrot.slane %v1889_v55, 4  ;;  %v1897_v25 = vrot.slane %v1896_v32, 4  ;;  %v1904_v27 = vrot.slane %v1903_v10, 4  ;;  %2006 = vmatpush.bf16.msra.mxu0 %v2350_v4 }
 0x675   : > { %v1910_v44 = vsel %vm707_vm1, %v1866_v43, -inf  ;;  %v1917_v59 = vsel %vm707_vm1, %v1867_v47, -inf  ;;  %v1924_v18 = vsel %vm707_vm1, %v1868_v62, -inf  ;;  %v1931_v29 = vsel %vm707_vm1, %v1869_v9, -inf }
 0x676   : > { %v1884_v31 = vmax.f32 %v1882_v22, %v1883_v26  ;;  %v1891_v3 = vmax.f32 %v1889_v55, %v1890_v24  ;;  %v1898_v19 = vmax.f32 %v1896_v32, %v1897_v25  ;;  %v1905_v33 = vmax.f32 %v1903_v10, %v1904_v27 }
 0x677   : > { %v1911_v35 = vrot.slane %v1910_v44, 4  ;;  %v1918_v36 = vrot.slane %v1917_v59, 4  ;;  %v1925_v7 = vrot.slane %v1924_v18, 4  ;;  %v1932_v6 = vrot.slane %v1931_v29, 4 }
 0x678   : > { %v1885_v37 = vrot.slane %v1884_v31, 2  ;;  %v1892_v38 = vrot.slane %v1891_v3, 2  ;;  %v1899_v15 = vrot.slane %v1898_v19, 2  ;;  %v1906_v8 = vrot.slane %v1905_v33, 2  ;;  %2007 = vmatpush.bf16.msra.mxu0 %v2349_v28 }
 0x679   : > { %v1912_v39 = vmax.f32 %v1910_v44, %v1911_v35  ;;  %v1919_v17 = vmax.f32 %v1917_v59, %v1918_v36  ;;  %v1926_v57 = vmax.f32 %v1924_v18, %v1925_v7  ;;  %v1933_v41 = vmax.f32 %v1931_v29, %v1932_v6  ;;  %v2459_v35 = vld [vmem:[%s3204_s13] ss:$0 sm:$0xff] }
 0x67a   : > { %v1886_v53 = vmax.f32 %v1884_v31, %v1885_v37  ;;  %v1893_v42 = vmax.f32 %v1891_v3, %v1892_v38  ;;  %v1900_v43 = vmax.f32 %v1898_v19, %v1899_v15  ;;  %v1907_v11 = vmax.f32 %v1905_v33, %v1906_v8 }
 0x67b   : > { %v1913_v16 = vrot.slane %v1912_v39, 2  ;;  %v1920_v0 = vrot.slane %v1919_v17, 2  ;;  %v1927_v23 = vrot.slane %v1926_v57, 2  ;;  %v1934_v47 = vrot.slane %v1933_v41, 2 }
 0x67c   : > { %v1887_v2 = vrot.slane %v1886_v53, 1  ;;  %v1894_v63 = vrot.slane %v1893_v42, 1  ;;  %v1901_v13 = vrot.slane %v1900_v43, 1  ;;  %v1908_v48 = vrot.slane %v1907_v11, 1 }
 0x67d   : > { %v1914_v45 = vmax.f32 %v1912_v39, %v1913_v16  ;;  %v1921_v49 = vmax.f32 %v1919_v17, %v1920_v0  ;;  %v1928_v1 = vmax.f32 %v1926_v57, %v1927_v23  ;;  %v1935_v40 = vmax.f32 %v1933_v41, %v1934_v47 }
 0x67e   : > { %v1888_v20 = vmax.f32 %v1886_v53, %v1887_v2  ;;  %v1895_v21 = vmax.f32 %v1893_v42, %v1894_v63  ;;  %v1902_v51 = vmax.f32 %v1900_v43, %v1901_v13  ;;  %v1909_v52 = vmax.f32 %v1907_v11, %v1908_v48 }
 0x67f   : > { %v1915_v54 = vrot.slane %v1914_v45, 1  ;;  %v1922_v12 = vrot.slane %v1921_v49, 1  ;;  %v1929_v34 = vrot.slane %v1928_v1, 1  ;;  %v1936_v56 = vrot.slane %v1935_v40, 1 }
 0x680   : > { %v1938_v58 = vpack.c.bf16 %v1888_v20, %v1888_v20  ;;  %v1939_v46 = vpack.c.bf16 %v1895_v21, %v1895_v21  ;;  %v1940_v60 = vpack.c.bf16 %v1902_v51, %v1902_v51  ;;  %v1941_v61 = vpack.c.bf16 %v1909_v52, %v1909_v52 }
 0x681   : > { %v1916_v62 = vmax.f32 %v1914_v45, %v1915_v54  ;;  %v1923_v30 = vmax.f32 %v1921_v49, %v1922_v12  ;;  %v1930_v14 = vmax.f32 %v1928_v1, %v1929_v34  ;;  %v1937_v50 = vmax.f32 %v1935_v40, %v1936_v56 }
 0x682   : > { %v1962_v5 = vunpack.c.l.b16 %v1938_v58  ;;  %v1963_v9 = vunpack.c.l.b16 %v1939_v46  ;;  %v1964_v32 = vunpack.c.l.b16 %v1940_v60  ;;  %v1965_v26 = vunpack.c.l.b16 %v1941_v61 }
 0x683   : > { %v1942_v4 = vpack.c.bf16 %v1916_v62, %v1916_v62  ;;  %v1943_v22 = vpack.c.bf16 %v1923_v30, %v1923_v30  ;;  %v1944_v55 = vpack.c.bf16 %v1930_v14, %v1930_v14  ;;  %v1945_v10 = vpack.c.bf16 %v1937_v50, %v1937_v50 }
 0x684   : > { %vm1970_vm8 = vcmask 1041409   ;;  %vm1972_vm9 = vcmask 1042434   ;;  %vm1974_vm10 = vcmask 1043459   ;;  %vm1976_vm11 = vcmask 1044484  }
 0x685   : > { %v1966_v24 = vunpack.c.l.b16 %v1942_v4  ;;  %v1967_v25 = vunpack.c.l.b16 %v1943_v22  ;;  %v1971_v27 = vsel %vm1970_vm8, %v1963_v9, %v1962_v5  ;;  %v1968_v28 = vunpack.c.l.b16 %v1944_v55 }
 0x686   : > { %v1973_v44 = vsel %vm1972_vm9, %v1964_v32, %v1971_v27  ;;  %vm1978_vm12 = vcmask 1045509   ;;  %v1969_v59 = vunpack.c.l.b16 %v1945_v10  ;;  %vm1980_vm13 = vcmask 1046534  }
 0x687   : > { %v1975_v18 = vsel %vm1974_vm10, %v1965_v26, %v1973_v44  ;;  %vm1982_vm14 = vcmask 1047559  }
 0x688   : > { %v1977_v29 = vsel %vm1976_vm11, %v1966_v24, %v1975_v18 }
 0x689   : > { %v1979_v31 = vsel %vm1978_vm12, %v1967_v25, %v1977_v29 }
 0x68a   : > { %v1981_v3 = vsel %vm1980_vm13, %v1968_v28, %v1979_v31 }
 0x68b   : > { %v1983_v19 = vsel %vm1982_vm14, %v1969_v59, %v1981_v3 }
 0x68c   : > { %v1984_v33 = vpack.c.b16 %v1983_v19, %v1983_v19 }
 0x68e   : > { %2323 = vmatmul.msk.bf16.vlgmr.msra.gmra.mxu0 %vm707_vm1, %v1984_v33 }
 0x70b   : > { %v2009_v36 = vpop.f32.mrf.mxu0 }
 0x70c   : > { %v2010_v7 = vadd.f32 %v2459_v35, %v2009_v36 }
 0x70e   : > { %2013 = vmax.xlane.f32.xlu0 %v2010_v7 }
 0x713   : > { %v2011_v6 = vpop.f32.mrf.mxu0 }
 0x781   : > { %v2014_v37 = vpop.xlane.xlu0 %2013 }
 0x782   : > { %v2015_v38 = vsub.f32 %v2010_v7, %v2014_v37 }
 0x784   : > { %v2016_v15 = vmul.f32 1.442695, %v2015_v38 }
 0x786   : > { %2460 = vpow2.f32 %v2016_v15 }
 0x78c   : > { %v2461_v8 = vpop.eup %2460 }
 0x78d   : > { %2018 = vadd.xlane.f32.xlu0 %v2461_v8 }
 0x800   : > { %v2019_v39 = vpop.xlane.xlu0 %2018 }
 0x801   : > { %2462 = vlog2.f32 %v2019_v39 }
 0x807   : > { %v2463_v17 = vpop.eup %2462 }
 0x808   : > { %v2021_v57 = vmul.f32 0.6931472, %v2463_v17 }
 0x80a   : > { %v2022_v41 = vsub.f32 %v2015_v38, %v2021_v57 }
 0x80c   : > { %2023 = vst [vmem:[#allocation3] sm:$0xff] %v2022_v41 }
 0x80d PF: > { %s3205_s30 = sld [smem:[#allocation7_spill]]  ;;  %s2521_s12 = smov [#allocation3]  }
 0x80e   : > { %s3207_s27 = sld [smem:[#allocation14_spill]]  ;;  %s2032_s14 = sshll.u32 %s2521_s12, 4  ;;  %s2033_s14 = int_to_ptr.vmem [resolvable:$true] %s2032_s14 }
 0x813   : > { %s3206_s25 = sadd.s32 4294967295, %s3205_s30  }
 0x814   : > { %p2359_p7 = scmp.eq.s32.totalorder %s3206_s25, 1  ;;  %s2034_s17 = sshll.u32 %s3207_s27, 4  ;;  %s2035_s17 = int_to_ptr.hbm [resolvable:$true] %s2034_s17 }
 0x816   : > { %2356 = dma.vmem_to_hbm [thread:$0]  (%p2359_p7), %s2033_s14, 128, %s2035_s17, [#allocation4]  }
 0x817   : > { %2505 = dma.done.wait (%p2359_p7), [#allocation4], 128  }
 0x818   : > { %2507 = vsyncadd (%p2359_p7), [#allocation4], 4294967168 }
 0x819 PF: > { %s3208_s26 = sld [smem:[#allocation7_spill]] }
 0x81a   : > { %s3209_s29 = sld [smem:[#allocation6_spill]] }
 0x81b   : > { %s3210_s30 = sld [smem:[#allocation8_spill]] }
 0x81f   : > { %s25_s15 = sadd.s32 1, %s3208_s26  }
 0x820   : > { %p22_p8 = scmp.ge.s32.totalorder %s25_s15, 4  }
 0x822   :  { %24 = sbr.rel (!%p22_p8) target bundleno = 9 (0x9), region = 145 }
 0x827   :  { %2048 = vsyncpa [#allocation4], 1 }
 0x828   :  { %2050 = vsyncpa [#allocation4 + $0x1], 1 }

</bundles_post_ra>
